<compile_context>
chip_gen: v7x
topology: tpu7x:2x2x1
jax: 0.10.0
libtpu: 0.0.40
codegen_flags: <defaults>
</compile_context>

<pallas_src>
import functools

import jax
import jax.numpy as jnp
from jax import lax
from jax.experimental import pallas as pl
from jax.experimental.pallas import tpu as pltpu

LN_EPS = 1e-5   # torch.nn.LayerNorm default
_LANE = 128
_SUBLANE = 8


def _round_up(n, m):
    return ((n + m - 1) // m) * m


# ----------------------------------------------------------------------------
# Host-side constant construction (one-time, outside the kernel)
# ----------------------------------------------------------------------------
def prepare_hnet_params(hyper_params, layer_dims, n_mlp_linears,
                        mxu_dtype=jnp.bfloat16):
    """Fuse per-layer hypernet params into the kernel's constant list.

    hyper_params[l] = [W_0, b_0, ..., W_{n-1}, b_{n-1}] with W_j as
    (in_features, out_features) so the forward is `h @ W_j + b_j`.

    Returned layout (matmul RHS in `mxu_dtype`, biases f32):
      [ W1_cat (hyper_in, L*H_pad), b1_cat,                       # fused level 0
        per middle tanh level: W_blk (L*H_pad, L*H_pad), b_cat,   # block-diagonal
        per target layer l:    W_last_l (H_pad, k_pad_l + o_pad_l), b_last_l,
                               R_l (in_k, k_pad_l), S_l (k_pad_l, out_k) ]
    """
    L = len(layer_dims)
    assert len(hyper_params) == L
    hyper_in = hyper_params[0][0].shape[0]
    hidden = hyper_params[0][0].shape[1]
    h_pad = _round_up(hidden, _LANE)
    for params in hyper_params:
        assert len(params) == 2 * n_mlp_linears
        assert params[0].shape == (hyper_in, hidden)

    consts = []

    # ---- level 0: one wide matmul feeding every target layer's MLP ----
    w1 = jnp.zeros((hyper_in, L * h_pad), jnp.float32)
    b1 = jnp.zeros((1, L * h_pad), jnp.float32)
    for l, params in enumerate(hyper_params):
        w1 = w1.at[:, l * h_pad:l * h_pad + hidden].set(params[0])
        b1 = b1.at[:, l * h_pad:l * h_pad + hidden].set(params[1].reshape(1, -1))
    consts += [w1.astype(mxu_dtype), b1]

    # ---- middle tanh levels: block-diagonal across target layers ----
    for j in range(1, n_mlp_linears - 1):
        wb = jnp.zeros((L * h_pad, L * h_pad), jnp.float32)
        bb = jnp.zeros((1, L * h_pad), jnp.float32)
        for l, params in enumerate(hyper_params):
            w, b = params[2 * j], params[2 * j + 1]
            wb = wb.at[l * h_pad:l * h_pad + hidden,
                       l * h_pad:l * h_pad + hidden].set(w)
            bb = bb.at[:, l * h_pad:l * h_pad + hidden].set(b.reshape(1, -1))
        consts += [wb.astype(mxu_dtype), bb]

    # ---- per target layer: fused (weights-head | bias-head) last linear + R/S ----
    for (in_k, out_k, _), params in zip(layer_dims, hyper_params):
        w_last = params[2 * (n_mlp_linears - 1)]
        b_last = params[2 * (n_mlp_linears - 1) + 1].reshape(1, -1)
        k = in_k * out_k
        k_pad = _round_up(k, _LANE)
        o_pad = _round_up(out_k, _LANE)
        wf = jnp.zeros((h_pad, k_pad + o_pad), jnp.float32)
        bf = jnp.zeros((1, k_pad + o_pad), jnp.float32)
        wf = wf.at[:hidden, :k].set(w_last[:, :k])
        wf = wf.at[:hidden, k_pad:k_pad + out_k].set(w_last[:, k:k + out_k])
        bf = bf.at[:, :k].set(b_last[:, :k])
        bf = bf.at[:, k_pad:k_pad + out_k].set(b_last[:, k:k + out_k])
        consts += [wf.astype(mxu_dtype), bf]

        # R (in_k, k_pad): act @ R replicates act out_k times; padding cols zero.
        i_idx = jnp.arange(in_k, dtype=jnp.int32)[:, None]
        j_idx = jnp.arange(k_pad, dtype=jnp.int32)[None, :]
        R = ((j_idx % in_k == i_idx) & (j_idx < k)).astype(mxu_dtype)
        # S (k_pad, out_k): segment-sum over i; padding rows zero.
        jj = jnp.arange(k_pad, dtype=jnp.int32)[:, None]
        oo = jnp.arange(out_k, dtype=jnp.int32)[None, :]
        S = ((jj // in_k == oo) & (jj < k)).astype(mxu_dtype)
        consts += [R, S]

    return consts


# ----------------------------------------------------------------------------
# Kernel
# ----------------------------------------------------------------------------
def _hnet_kernel(layer_dims, n_mlp_linears, h_pad, mxu_dtype,
                 damping_ref, h0_ref, x_ref, *refs):
    """Whole H_Net forward for one batch tile.

    refs = [ W1_cat, b1_cat,
             (W_blk, b_cat) per middle tanh level,
             (W_last, b_last, R, S) per target layer,
             out_ref ]
    """
    out_ref = refs[-1]
    c = refs[:-1]

    d = damping_ref[0, 0]                            # SMEM scalar
    d = jnp.minimum(jnp.maximum(d, 0.0), 1.0)        # damping.clamp(0, 1)
    x = x_ref[...]                                   # (Bt, in_ch)
    hyper_in = d * h0_ref[...] + (1.0 - d) * x       # shared hypernetwork input

    # ---- fused hypernetwork (bf16 MXU inputs, f32 accumulation) ----
    r = 0
    w1, b1 = c[r][...], c[r + 1][...]
    r += 2
    h_all = jnp.tanh(jnp.dot(hyper_in.astype(mxu_dtype), w1,
                             preferred_element_type=jnp.float32) + b1)
    for _ in range(n_mlp_linears - 2):               # block-diagonal middle levels
        wj, bj = c[r][...], c[r + 1][...]
        r += 2
        h_all = jnp.tanh(jnp.dot(h_all.astype(mxu_dtype), wj,
                                 preferred_element_type=jnp.float32) + bj)
    h_all = h_all.astype(mxu_dtype)                  # (Bt, L*h_pad), lane-aligned blocks

    # ---- per-layer last linear: fused W-head|bias-head, all hoisted up front ----
    w_flats, biases, sels = [], [], []
    for l, (in_k, out_k, _) in enumerate(layer_dims):
        k_pad = _round_up(in_k * out_k, _LANE)
        w_last, b_last, R, S = (c[r][...], c[r + 1][...],
                                c[r + 2][...], c[r + 3][...])
        r += 4
        h_l = h_all[:, l * h_pad:(l + 1) * h_pad]    # lane-aligned static slice
        y = jnp.dot(h_l, w_last, preferred_element_type=jnp.float32) + b_last
        w_flats.append(y[:, :k_pad])                 # (Bt, k_pad)
        biases.append(y[:, k_pad:k_pad + out_k])     # (Bt, out_k)
        sels.append((R, S))

    # ---- sequential predicted network: replicate / mask-multiply / segment-sum ----
    act = x
    for l, (in_k, out_k, with_norm) in enumerate(layer_dims):
        R, S = sels[l]
        act_rep = jnp.dot(act.astype(mxu_dtype), R,
                          preferred_element_type=jnp.float32)          # (Bt, k_pad)
        z = jnp.dot((act_rep * w_flats[l]).astype(mxu_dtype), S,
                    preferred_element_type=jnp.float32) + biases[l]    # (Bt, out_k)
        if with_norm:                                # LayerNorm(no affine) + Tanh
            mu = jnp.mean(z, axis=-1, keepdims=True)
            var = jnp.mean((z - mu) ** 2, axis=-1, keepdims=True)
            z = jnp.tanh((z - mu) * lax.rsqrt(var + LN_EPS))
        act = z

    out_ref[...] = act                               # (Bt, out_ch)


# ----------------------------------------------------------------------------
# Wrapper
# ----------------------------------------------------------------------------
def h_net_forward(damping, h0, h_t, x, consts, layer_dims, n_mlp_linears,
                  mxu_dtype=jnp.bfloat16, batch_block=None):
    """Pallas wrapper. h_t is accepted for signature fidelity but unused (as in PyTorch)."""
    del h_t
    B, in_ch = x.shape
    out_ch = layer_dims[-1][1]
    L = len(layer_dims)
    h_pad = consts[0].shape[1] // L

    # Batch tile: amortize ~0.35us/grid-step overhead with big tiles, prefer >=2
    # tiles so dimension_semantics=("parallel",) shards across v7x's 2 TCs, cap
    # at 1024 rows to keep f32 intermediates within v7x's 64 MiB VMEM.
    if batch_block is None:
        batch_block = _round_up(pl.cdiv(B, 2), _SUBLANE) if B <= 2048 else 1024
    batch_block = max(_SUBLANE, min(_round_up(batch_block, _SUBLANE), 1024))
    padded_B = _round_up(B, batch_block)
    if padded_B != B:                                # ragged batch -> zero-pad (LN of a
        pad = padded_B - B                           # zero row is finite), slice off after
        h0 = jnp.pad(h0, ((0, pad), (0, 0)))
        x = jnp.pad(x, ((0, pad), (0, 0)))
    grid = (padded_B // batch_block,)

    vmem_full = pl.BlockSpec(memory_space=pltpu.MemorySpace.VMEM)   # resident weights/selectors
    smem_full = pl.BlockSpec(memory_space=pltpu.MemorySpace.SMEM)   # damping scalar
    in_specs = ([smem_full,
                 pl.BlockSpec((batch_block, in_ch), lambda i: (i, 0)),
                 pl.BlockSpec((batch_block, in_ch), lambda i: (i, 0))]
                + [vmem_full] * len(consts))
    out_spec = pl.BlockSpec((batch_block, out_ch), lambda i: (i, 0))

    # Advisory cost estimate: every bf16 const is exactly one matmul RHS.
    flops = sum(2 * padded_B * int(c.shape[0]) * int(c.shape[1])
                for c in consts if c.dtype != jnp.float32)
    transcendentals = padded_B * ((n_mlp_linears - 1) * L * h_pad
                                  + sum(ok + 1 for _, ok, wn in layer_dims if wn))
    const_bytes = sum(int(c.size) * c.dtype.itemsize for c in consts)
    bytes_accessed = const_bytes + 4 * int(h0.size + x.size + padded_B * out_ch) + 4

    # Explicit VMEM budget (scoped defaults: 16 MiB v5e / 32 MiB v6e+), clamped to
    # v7x's 64 MiB physical.
    k_pads = [_round_up(ik * ok, _LANE) for ik, ok, _ in layer_dims]
    o_pads = [_round_up(ok, _LANE) for _, ok, _ in layer_dims]
    inter_bytes = 4 * batch_block * (L * h_pad
                                     + sum(kp + op for kp, op in zip(k_pads, o_pads))
                                     + 3 * max(k_pads))
    io_bytes = 4 * batch_block * (2 * 2 * in_ch + 2 * out_ch)
    vmem_limit = int(min(64 * 1024 * 1024,
                         max(32 * 1024 * 1024,
                             2 * (const_bytes + inter_bytes + io_bytes))))

    # TODO(synk): if hidden_ch is ever scaled (>=256) the fused last-linear weight
    # (h_pad, in_k*out_k + 128) grows quadratically; tile it over out_k chunks with a
    # BlockSpec grid axis instead of keeping everything whole-array resident.
    kernel = functools.partial(_hnet_kernel, layer_dims, n_mlp_linears, h_pad, mxu_dtype)
    out = pl.pallas_call(
        kernel,
        grid=grid,
        out_shape=jax.ShapeDtypeStruct((padded_B, out_ch), jnp.float32),
        in_specs=in_specs,
        out_specs=out_spec,
        compiler_params=pltpu.CompilerParams(
            dimension_semantics=("parallel",),
            vmem_limit_bytes=vmem_limit),
        cost_estimate=pl.CostEstimate(flops=int(flops),
                                      transcendentals=int(transcendentals),
                                      bytes_accessed=int(bytes_accessed)),
    )(jnp.reshape(damping, (1, 1)), h0, x, *consts)
    return out[:B]


# ----------------------------------------------------------------------------
# Plain-JAX reference (float32, HIGHEST precision) mirroring PyTorch semantics
# ----------------------------------------------------------------------------
def h_net_reference(damping, h0, x, hyper_params, layer_dims):
    d = jnp.clip(damping[0], 0.0, 1.0)
    hyper_in = d * h0 + (1.0 - d) * x
    act = x
    for (in_k, out_k, with_norm), params in zip(layer_dims, hyper_params):
        h = hyper_in
        n = len(params) // 2
        for j in range(n):
            h = h @ params[2 * j] + params[2 * j + 1]
            if j < n - 1:
                h = jnp.tanh(h)
        w_flat = h[:, : in_k * out_k]
        bias = h[:, in_k * out_k: in_k * out_k + out_k]
        W = w_flat.reshape(-1, out_k, in_k)
        z = jnp.einsum("bi,boi->bo", act, W,
                       precision=lax.Precision.HIGHEST) + bias
        if with_norm:
            mu = z.mean(-1, keepdims=True)
            var = ((z - mu) ** 2).mean(-1, keepdims=True)
            z = jnp.tanh((z - mu) / jnp.sqrt(var + LN_EPS))
        act = z
    return act


if __name__ == "__main__":
    key = jax.random.PRNGKey(0)

    # small shapes consistent with H_Net (hyper_in_ch must equal in_ch for the
    # damping blend `d*h_0 + (1-d)*x` to broadcast)
    B = 4
    hyper_in_ch = in_ch = 16
    hyper_hidden_ch = 32
    hyper_num_hidden_layers = 1
    hidden_ch = 32
    num_hidden_layers = 1
    out_ch = 8
    n_mlp_linears = 2 + hyper_num_hidden_layers  # FCBlock with outermost_linear=True

    # predicted-network structure (HyperFC with outermost_linear=True):
    #   (in_ch -> hidden) +LN+tanh, (hidden -> hidden) +LN+tanh, (hidden -> out) linear
    layer_dims = [(in_ch, hidden_ch, True)]
    for _ in range(num_hidden_layers):
        layer_dims.append((hidden_ch, hidden_ch, True))
    layer_dims.append((hidden_ch, out_ch, False))

    # deterministic parameter init (kaiming-normal fan_in weights, uniform biases,
    # last hypernet layer weight scaled by 0.1 as in last_hyper_layer_init)
    hyper_params = []
    for (ik, ok, _) in layer_dims:
        dims = [hyper_in_ch] + [hyper_hidden_ch] * (1 + hyper_num_hidden_layers) + [ik * ok + ok]
        params = []
        for j in range(len(dims) - 1):
            key, kw, kb = jax.random.split(key, 3)
            fan_in, fan_out = dims[j], dims[j + 1]
            std = (2.0 / fan_in) ** 0.5
            w = std * jax.random.normal(kw, (fan_in, fan_out), jnp.float32)
            if j == len(dims) - 2:
                w = w * 0.1
            bound = 1.0 / (fan_in ** 0.5)
            b = jax.random.uniform(kb, (1, fan_out), jnp.float32, -bound, bound)
            params.extend([w, b])
        hyper_params.append(params)

    key, kd, kh0, kht, kx = jax.random.split(key, 5)
    damping = jax.random.uniform(kd, (1,), jnp.float32)          # clamped inside the kernel
    h_0 = jax.random.normal(kh0, (B, hyper_in_ch), jnp.float32)
    h_t = jax.random.normal(kht, (B, hyper_in_ch), jnp.float32)  # unused by H_Net.forward
    x = jax.random.normal(kx, (B, in_ch), jnp.float32)

    consts = prepare_hnet_params(hyper_params, layer_dims, n_mlp_linears,
                                 mxu_dtype=jnp.bfloat16)
    out = h_net_forward(damping, h_0, h_t, x, consts, layer_dims, n_mlp_linears)
    out = jax.block_until_ready(out)

    ref = h_net_reference(damping, h_0, x, hyper_params, layer_dims)
    assert out.shape == (B, out_ch), out.shape
    # Kernel runs all MXU inputs in bf16 (f32 accumulation) per v5e/v6e/v7x guidance,
    # while the reference is f32 at HIGHEST precision -> bf16-operand tolerance.
    assert jnp.allclose(out, ref, atol=3e-2, rtol=3e-2), float(jnp.max(jnp.abs(out - ref)))

    print("KERNEL_OK")
</pallas_src>

<mosaic_0001>
module attributes {stable_mosaic.version = 11 : i64} {
  func.func @_hnet_kernel(%arg0: i32, %arg1: memref<1x1xf32, #tpu.memory_space<smem>>, %arg2: memref<8x16xf32, #tpu.memory_space<vmem>>, %arg3: memref<8x16xf32, #tpu.memory_space<vmem>>, %arg4: memref<16x384xbf16, #tpu.memory_space<vmem>>, %arg5: memref<1x384xf32, #tpu.memory_space<vmem>>, %arg6: memref<384x384xbf16, #tpu.memory_space<vmem>>, %arg7: memref<1x384xf32, #tpu.memory_space<vmem>>, %arg8: memref<128x640xbf16, #tpu.memory_space<vmem>>, %arg9: memref<1x640xf32, #tpu.memory_space<vmem>>, %arg10: memref<16x512xbf16, #tpu.memory_space<vmem>>, %arg11: memref<512x32xbf16, #tpu.memory_space<vmem>>, %arg12: memref<128x1152xbf16, #tpu.memory_space<vmem>>, %arg13: memref<1x1152xf32, #tpu.memory_space<vmem>>, %arg14: memref<32x1024xbf16, #tpu.memory_space<vmem>>, %arg15: memref<1024x32xbf16, #tpu.memory_space<vmem>>, %arg16: memref<128x384xbf16, #tpu.memory_space<vmem>>, %arg17: memref<1x384xf32, #tpu.memory_space<vmem>>, %arg18: memref<32x256xbf16, #tpu.memory_space<vmem>>, %arg19: memref<256x8xbf16, #tpu.memory_space<vmem>>, %arg20: memref<8x8xf32, #tpu.memory_space<vmem>>) attributes {dimension_semantics = [#tpu.dimension_semantics<parallel>], iteration_bounds = array<i64: 1>, scalar_prefetch = 0 : i64, scratch_operands = 0 : i64, tpu.core_type = #tpu.core_type<tc>, window_params = [{transform_indices = @transform_0, window_bounds = array<i64: 1, 1>}, {transform_indices = @transform_1, window_bounds = array<i64: 8, 16>}, {transform_indices = @transform_2, window_bounds = array<i64: 8, 16>}, {pipeline_mode = #tpu.pipeline_mode<synchronous>, transform_indices = @transform_3, window_bounds = array<i64: 16, 384>}, {pipeline_mode = #tpu.pipeline_mode<synchronous>, transform_indices = @transform_4, window_bounds = array<i64: 1, 384>}, {pipeline_mode = #tpu.pipeline_mode<synchronous>, transform_indices = @transform_5, window_bounds = array<i64: 384, 384>}, {pipeline_mode = #tpu.pipeline_mode<synchronous>, transform_indices = @transform_6, window_bounds = array<i64: 1, 384>}, {pipeline_mode = #tpu.pipeline_mode<synchronous>, transform_indices = @transform_7, window_bounds = array<i64: 128, 640>}, {pipeline_mode = #tpu.pipeline_mode<synchronous>, transform_indices = @transform_8, window_bounds = array<i64: 1, 640>}, {pipeline_mode = #tpu.pipeline_mode<synchronous>, transform_indices = @transform_9, window_bounds = array<i64: 16, 512>}, {pipeline_mode = #tpu.pipeline_mode<synchronous>, transform_indices = @transform_10, window_bounds = array<i64: 512, 32>}, {pipeline_mode = #tpu.pipeline_mode<synchronous>, transform_indices = @transform_11, window_bounds = array<i64: 128, 1152>}, {pipeline_mode = #tpu.pipeline_mode<synchronous>, transform_indices = @transform_12, window_bounds = array<i64: 1, 1152>}, {pipeline_mode = #tpu.pipeline_mode<synchronous>, transform_indices = @transform_13, window_bounds = array<i64: 32, 1024>}, {pipeline_mode = #tpu.pipeline_mode<synchronous>, transform_indices = @transform_14, window_bounds = array<i64: 1024, 32>}, {pipeline_mode = #tpu.pipeline_mode<synchronous>, transform_indices = @transform_15, window_bounds = array<i64: 128, 384>}, {pipeline_mode = #tpu.pipeline_mode<synchronous>, transform_indices = @transform_16, window_bounds = array<i64: 1, 384>}, {pipeline_mode = #tpu.pipeline_mode<synchronous>, transform_indices = @transform_17, window_bounds = array<i64: 32, 256>}, {pipeline_mode = #tpu.pipeline_mode<synchronous>, transform_indices = @transform_18, window_bounds = array<i64: 256, 8>}, {transform_indices = @transform_19, window_bounds = array<i64: 8, 8>}]} {
    %c0 = arith.constant 0 : index
    %c0_0 = arith.constant 0 : index
    %0 = memref.load %arg1[%c0, %c0_0] : memref<1x1xf32, #tpu.memory_space<smem>>
    %cst = arith.constant 0.000000e+00 : f32
    %1 = arith.maximumf %0, %cst : f32
    %cst_1 = arith.constant 1.000000e+00 : f32
    %2 = arith.minimumf %1, %cst_1 : f32
    %c0_2 = arith.constant 0 : index
    %c0_3 = arith.constant 0 : index
    %3 = vector.load %arg3[%c0_2, %c0_3] : memref<8x16xf32, #tpu.memory_space<vmem>>, vector<8x16xf32>
    %c0_4 = arith.constant 0 : index
    %c0_5 = arith.constant 0 : index
    %4 = vector.load %arg2[%c0_4, %c0_5] : memref<8x16xf32, #tpu.memory_space<vmem>>, vector<8x16xf32>
    %5 = vector.broadcast %2 : f32 to vector<8x16xf32>
    %6 = arith.mulf %5, %4 : vector<8x16xf32>
    %cst_6 = arith.constant 1.000000e+00 : f32
    %7 = arith.subf %cst_6, %2 : f32
    %8 = vector.broadcast %7 : f32 to vector<8x16xf32>
    %9 = arith.mulf %8, %3 : vector<8x16xf32>
    %10 = arith.addf %6, %9 : vector<8x16xf32>
    %c0_7 = arith.constant 0 : index
    %c0_8 = arith.constant 0 : index
    %11 = vector.load %arg4[%c0_7, %c0_8] : memref<16x384xbf16, #tpu.memory_space<vmem>>, vector<16x384xbf16>
    %c0_9 = arith.constant 0 : index
    %c0_10 = arith.constant 0 : index
    %12 = vector.load %arg5[%c0_9, %c0_10] : memref<1x384xf32, #tpu.memory_space<vmem>>, vector<1x384xf32>
    %13 = arith.truncf %10 : vector<8x16xf32> to vector<8x16xbf16>
    %cst_11 = arith.constant dense<0.000000e+00> : vector<8x384xf32>
    %14 = tpu.matmul %13, %11, %cst_11 {dimension_numbers = #tpu.dot_dimension_numbers<[1], [0], [0], [1], [0, 0, 1, 1], [], []>} : vector<8x16xbf16>, vector<16x384xbf16>, vector<8x384xf32> -> vector<8x384xf32>
    %15 = vector.broadcast %12 : vector<1x384xf32> to vector<8x384xf32>
    %16 = arith.addf %14, %15 : vector<8x384xf32>
    %17 = math.tanh %16 : vector<8x384xf32>
    %c0_12 = arith.constant 0 : index
    %c0_13 = arith.constant 0 : index
    %18 = vector.load %arg6[%c0_12, %c0_13] : memref<384x384xbf16, #tpu.memory_space<vmem>>, vector<384x384xbf16>
    %c0_14 = arith.constant 0 : index
    %c0_15 = arith.constant 0 : index
    %19 = vector.load %arg7[%c0_14, %c0_15] : memref<1x384xf32, #tpu.memory_space<vmem>>, vector<1x384xf32>
    %20 = arith.truncf %17 : vector<8x384xf32> to vector<8x384xbf16>
    %cst_16 = arith.constant dense<0.000000e+00> : vector<8x384xf32>
    %21 = tpu.matmul %20, %18, %cst_16 {dimension_numbers = #tpu.dot_dimension_numbers<[1], [0], [0], [1], [0, 0, 1, 1], [], []>} : vector<8x384xbf16>, vector<384x384xbf16>, vector<8x384xf32> -> vector<8x384xf32>
    %22 = vector.broadcast %19 : vector<1x384xf32> to vector<8x384xf32>
    %23 = arith.addf %21, %22 : vector<8x384xf32>
    %24 = math.tanh %23 : vector<8x384xf32>
    %25 = arith.truncf %24 : vector<8x384xf32> to vector<8x384xbf16>
    %c0_17 = arith.constant 0 : index
    %c0_18 = arith.constant 0 : index
    %26 = vector.load %arg8[%c0_17, %c0_18] : memref<128x640xbf16, #tpu.memory_space<vmem>>, vector<128x640xbf16>
    %c0_19 = arith.constant 0 : index
    %c0_20 = arith.constant 0 : index
    %27 = vector.load %arg9[%c0_19, %c0_20] : memref<1x640xf32, #tpu.memory_space<vmem>>, vector<1x640xf32>
    %c0_21 = arith.constant 0 : index
    %c0_22 = arith.constant 0 : index
    %28 = vector.load %arg10[%c0_21, %c0_22] : memref<16x512xbf16, #tpu.memory_space<vmem>>, vector<16x512xbf16>
    %c0_23 = arith.constant 0 : index
    %c0_24 = arith.constant 0 : index
    %29 = vector.load %arg11[%c0_23, %c0_24] : memref<512x32xbf16, #tpu.memory_space<vmem>>, vector<512x32xbf16>
    %30 = vector.extract_strided_slice %25 {offsets = [0, 0], sizes = [8, 128], strides = [1, 1]} : vector<8x384xbf16> to vector<8x128xbf16>
    %cst_25 = arith.constant dense<0.000000e+00> : vector<8x640xf32>
    %31 = tpu.matmul %30, %26, %cst_25 {dimension_numbers = #tpu.dot_dimension_numbers<[1], [0], [0], [1], [0, 0, 1, 1], [], []>} : vector<8x128xbf16>, vector<128x640xbf16>, vector<8x640xf32> -> vector<8x640xf32>
    %32 = vector.broadcast %27 : vector<1x640xf32> to vector<8x640xf32>
    %33 = arith.addf %31, %32 : vector<8x640xf32>
    %34 = vector.extract_strided_slice %33 {offsets = [0, 0], sizes = [8, 512], strides = [1, 1]} : vector<8x640xf32> to vector<8x512xf32>
    %35 = vector.extract_strided_slice %33 {offsets = [0, 512], sizes = [8, 32], strides = [1, 1]} : vector<8x640xf32> to vector<8x32xf32>
    %c0_26 = arith.constant 0 : index
    %c0_27 = arith.constant 0 : index
    %36 = vector.load %arg12[%c0_26, %c0_27] : memref<128x1152xbf16, #tpu.memory_space<vmem>>, vector<128x1152xbf16>
    %c0_28 = arith.constant 0 : index
    %c0_29 = arith.constant 0 : index
    %37 = vector.load %arg13[%c0_28, %c0_29] : memref<1x1152xf32, #tpu.memory_space<vmem>>, vector<1x1152xf32>
    %c0_30 = arith.constant 0 : index
    %c0_31 = arith.constant 0 : index
    %38 = vector.load %arg14[%c0_30, %c0_31] : memref<32x1024xbf16, #tpu.memory_space<vmem>>, vector<32x1024xbf16>
    %c0_32 = arith.constant 0 : index
    %c0_33 = arith.constant 0 : index
    %39 = vector.load %arg15[%c0_32, %c0_33] : memref<1024x32xbf16, #tpu.memory_space<vmem>>, vector<1024x32xbf16>
    %40 = vector.extract_strided_slice %25 {offsets = [0, 128], sizes = [8, 128], strides = [1, 1]} : vector<8x384xbf16> to vector<8x128xbf16>
    %cst_34 = arith.constant dense<0.000000e+00> : vector<8x1152xf32>
    %41 = tpu.matmul %40, %36, %cst_34 {dimension_numbers = #tpu.dot_dimension_numbers<[1], [0], [0], [1], [0, 0, 1, 1], [], []>} : vector<8x128xbf16>, vector<128x1152xbf16>, vector<8x1152xf32> -> vector<8x1152xf32>
    %42 = vector.broadcast %37 : vector<1x1152xf32> to vector<8x1152xf32>
    %43 = arith.addf %41, %42 : vector<8x1152xf32>
    %44 = vector.extract_strided_slice %43 {offsets = [0, 0], sizes = [8, 1024], strides = [1, 1]} : vector<8x1152xf32> to vector<8x1024xf32>
    %45 = vector.extract_strided_slice %43 {offsets = [0, 1024], sizes = [8, 32], strides = [1, 1]} : vector<8x1152xf32> to vector<8x32xf32>
    %c0_35 = arith.constant 0 : index
    %c0_36 = arith.constant 0 : index
    %46 = vector.load %arg16[%c0_35, %c0_36] : memref<128x384xbf16, #tpu.memory_space<vmem>>, vector<128x384xbf16>
    %c0_37 = arith.constant 0 : index
    %c0_38 = arith.constant 0 : index
    %47 = vector.load %arg17[%c0_37, %c0_38] : memref<1x384xf32, #tpu.memory_space<vmem>>, vector<1x384xf32>
    %c0_39 = arith.constant 0 : index
    %c0_40 = arith.constant 0 : index
    %48 = vector.load %arg18[%c0_39, %c0_40] : memref<32x256xbf16, #tpu.memory_space<vmem>>, vector<32x256xbf16>
    %c0_41 = arith.constant 0 : index
    %c0_42 = arith.constant 0 : index
    %49 = vector.load %arg19[%c0_41, %c0_42] : memref<256x8xbf16, #tpu.memory_space<vmem>>, vector<256x8xbf16>
    %50 = vector.extract_strided_slice %25 {offsets = [0, 256], sizes = [8, 128], strides = [1, 1]} : vector<8x384xbf16> to vector<8x128xbf16>
    %cst_43 = arith.constant dense<0.000000e+00> : vector<8x384xf32>
    %51 = tpu.matmul %50, %46, %cst_43 {dimension_numbers = #tpu.dot_dimension_numbers<[1], [0], [0], [1], [0, 0, 1, 1], [], []>} : vector<8x128xbf16>, vector<128x384xbf16>, vector<8x384xf32> -> vector<8x384xf32>
    %52 = vector.broadcast %47 : vector<1x384xf32> to vector<8x384xf32>
    %53 = arith.addf %51, %52 : vector<8x384xf32>
    %54 = vector.extract_strided_slice %53 {offsets = [0, 0], sizes = [8, 256], strides = [1, 1]} : vector<8x384xf32> to vector<8x256xf32>
    %55 = vector.extract_strided_slice %53 {offsets = [0, 256], sizes = [8, 8], strides = [1, 1]} : vector<8x384xf32> to vector<8x8xf32>
    %56 = arith.truncf %3 : vector<8x16xf32> to vector<8x16xbf16>
    %cst_44 = arith.constant dense<0.000000e+00> : vector<8x512xf32>
    %57 = tpu.matmul %56, %28, %cst_44 {dimension_numbers = #tpu.dot_dimension_numbers<[1], [0], [0], [1], [0, 0, 1, 1], [], []>} : vector<8x16xbf16>, vector<16x512xbf16>, vector<8x512xf32> -> vector<8x512xf32>
    %58 = arith.mulf %57, %34 : vector<8x512xf32>
    %59 = arith.truncf %58 : vector<8x512xf32> to vector<8x512xbf16>
    %cst_45 = arith.constant dense<0.000000e+00> : vector<8x32xf32>
    %60 = tpu.matmul %59, %29, %cst_45 {dimension_numbers = #tpu.dot_dimension_numbers<[1], [0], [0], [1], [0, 0, 1, 1], [], []>} : vector<8x512xbf16>, vector<512x32xbf16>, vector<8x32xf32> -> vector<8x32xf32>
    %61 = arith.addf %60, %35 : vector<8x32xf32>
    %cst_46 = arith.constant dense<0.000000e+00> : vector<8xf32>
    %62 = vector.multi_reduction <add>, %61, %cst_46 [1] : vector<8x32xf32> to vector<8xf32>
    %63 = vector.shape_cast %62 : vector<8xf32> to vector<8x1xf32>
    %cst_47 = arith.constant 3.200000e+01 : f32
    %64 = vector.broadcast %cst_47 : f32 to vector<8x1xf32>
    %65 = arith.divf %63, %64 : vector<8x1xf32>
    %66 = vector.broadcast %65 : vector<8x1xf32> to vector<8x32xf32>
    %67 = arith.subf %61, %66 : vector<8x32xf32>
    %68 = arith.mulf %67, %67 : vector<8x32xf32>
    %cst_48 = arith.constant dense<0.000000e+00> : vector<8xf32>
    %69 = vector.multi_reduction <add>, %68, %cst_48 [1] : vector<8x32xf32> to vector<8xf32>
    %70 = vector.shape_cast %69 : vector<8xf32> to vector<8x1xf32>
    %cst_49 = arith.constant 3.200000e+01 : f32
    %71 = vector.broadcast %cst_49 : f32 to vector<8x1xf32>
    %72 = arith.divf %70, %71 : vector<8x1xf32>
    %73 = vector.broadcast %65 : vector<8x1xf32> to vector<8x32xf32>
    %74 = arith.subf %61, %73 : vector<8x32xf32>
    %cst_50 = arith.constant 9.99999974E-6 : f32
    %75 = vector.broadcast %cst_50 : f32 to vector<8x1xf32>
    %76 = arith.addf %72, %75 : vector<8x1xf32>
    %77 = math.rsqrt %76 : vector<8x1xf32>
    %78 = vector.broadcast %77 : vector<8x1xf32> to vector<8x32xf32>
    %79 = arith.mulf %74, %78 : vector<8x32xf32>
    %80 = math.tanh %79 : vector<8x32xf32>
    %81 = arith.truncf %80 : vector<8x32xf32> to vector<8x32xbf16>
    %cst_51 = arith.constant dense<0.000000e+00> : vector<8x1024xf32>
    %82 = tpu.matmul %81, %38, %cst_51 {dimension_numbers = #tpu.dot_dimension_numbers<[1], [0], [0], [1], [0, 0, 1, 1], [], []>} : vector<8x32xbf16>, vector<32x1024xbf16>, vector<8x1024xf32> -> vector<8x1024xf32>
    %83 = arith.mulf %82, %44 : vector<8x1024xf32>
    %84 = arith.truncf %83 : vector<8x1024xf32> to vector<8x1024xbf16>
    %cst_52 = arith.constant dense<0.000000e+00> : vector<8x32xf32>
    %85 = tpu.matmul %84, %39, %cst_52 {dimension_numbers = #tpu.dot_dimension_numbers<[1], [0], [0], [1], [0, 0, 1, 1], [], []>} : vector<8x1024xbf16>, vector<1024x32xbf16>, vector<8x32xf32> -> vector<8x32xf32>
    %86 = arith.addf %85, %45 : vector<8x32xf32>
    %cst_53 = arith.constant dense<0.000000e+00> : vector<8xf32>
    %87 = vector.multi_reduction <add>, %86, %cst_53 [1] : vector<8x32xf32> to vector<8xf32>
    %88 = vector.shape_cast %87 : vector<8xf32> to vector<8x1xf32>
    %cst_54 = arith.constant 3.200000e+01 : f32
    %89 = vector.broadcast %cst_54 : f32 to vector<8x1xf32>
    %90 = arith.divf %88, %89 : vector<8x1xf32>
    %91 = vector.broadcast %90 : vector<8x1xf32> to vector<8x32xf32>
    %92 = arith.subf %86, %91 : vector<8x32xf32>
    %93 = arith.mulf %92, %92 : vector<8x32xf32>
    %cst_55 = arith.constant dense<0.000000e+00> : vector<8xf32>
    %94 = vector.multi_reduction <add>, %93, %cst_55 [1] : vector<8x32xf32> to vector<8xf32>
    %95 = vector.shape_cast %94 : vector<8xf32> to vector<8x1xf32>
    %cst_56 = arith.constant 3.200000e+01 : f32
    %96 = vector.broadcast %cst_56 : f32 to vector<8x1xf32>
    %97 = arith.divf %95, %96 : vector<8x1xf32>
    %98 = vector.broadcast %90 : vector<8x1xf32> to vector<8x32xf32>
    %99 = arith.subf %86, %98 : vector<8x32xf32>
    %cst_57 = arith.constant 9.99999974E-6 : f32
    %100 = vector.broadcast %cst_57 : f32 to vector<8x1xf32>
    %101 = arith.addf %97, %100 : vector<8x1xf32>
    %102 = math.rsqrt %101 : vector<8x1xf32>
    %103 = vector.broadcast %102 : vector<8x1xf32> to vector<8x32xf32>
    %104 = arith.mulf %99, %103 : vector<8x32xf32>
    %105 = math.tanh %104 : vector<8x32xf32>
    %106 = arith.truncf %105 : vector<8x32xf32> to vector<8x32xbf16>
    %cst_58 = arith.constant dense<0.000000e+00> : vector<8x256xf32>
    %107 = tpu.matmul %106, %48, %cst_58 {dimension_numbers = #tpu.dot_dimension_numbers<[1], [0], [0], [1], [0, 0, 1, 1], [], []>} : vector<8x32xbf16>, vector<32x256xbf16>, vector<8x256xf32> -> vector<8x256xf32>
    %108 = arith.mulf %107, %54 : vector<8x256xf32>
    %109 = arith.truncf %108 : vector<8x256xf32> to vector<8x256xbf16>
    %cst_59 = arith.constant dense<0.000000e+00> : vector<8x8xf32>
    %110 = tpu.matmul %109, %49, %cst_59 {dimension_numbers = #tpu.dot_dimension_numbers<[1], [0], [0], [1], [0, 0, 1, 1], [], []>} : vector<8x256xbf16>, vector<256x8xbf16>, vector<8x8xf32> -> vector<8x8xf32>
    %111 = arith.addf %110, %55 : vector<8x8xf32>
    %c0_60 = arith.constant 0 : index
    %c0_61 = arith.constant 0 : index
    %112 = vector.load %arg20[%c0_60, %c0_61] : memref<8x8xf32, #tpu.memory_space<vmem>>, vector<8x8xf32>
    tpu.vector_store %arg20[%c0_60, %c0_61], %111 {strides = array<i32>} : memref<8x8xf32, #tpu.memory_space<vmem>>, vector<8x8xf32>,
    return
  }
  func.func @transform_0(%arg0: i32) -> (i32, i32) {
    %c0_i32 = arith.constant 0 : i32
    %c0_i32_0 = arith.constant 0 : i32
    %c0_i32_1 = arith.constant 0 : i32
    return %c0_i32, %c0_i32_0 : i32, i32
  }
  func.func @transform_1(%arg0: i32) -> (i32, i32) {
    %c0_i32 = arith.constant 0 : i32
    %c0_i32_0 = arith.constant 0 : i32
    return %arg0, %c0_i32 : i32, i32
  }
  func.func @transform_2(%arg0: i32) -> (i32, i32) {
    %c0_i32 = arith.constant 0 : i32
    %c0_i32_0 = arith.constant 0 : i32
    return %arg0, %c0_i32 : i32, i32
  }
  func.func @transform_3(%arg0: i32) -> (i32, i32) {
    %c0_i32 = arith.constant 0 : i32
    %c0_i32_0 = arith.constant 0 : i32
    %c0_i32_1 = arith.constant 0 : i32
    return %c0_i32, %c0_i32_0 : i32, i32
  }
  func.func @transform_4(%arg0: i32) -> (i32, i32) {
    %c0_i32 = arith.constant 0 : i32
    %c0_i32_0 = arith.constant 0 : i32
    %c0_i32_1 = arith.constant 0 : i32
    return %c0_i32, %c0_i32_0 : i32, i32
  }
  func.func @transform_5(%arg0: i32) -> (i32, i32) {
    %c0_i32 = arith.constant 0 : i32
    %c0_i32_0 = arith.constant 0 : i32
    %c0_i32_1 = arith.constant 0 : i32
    return %c0_i32, %c0_i32_0 : i32, i32
  }
  func.func @transform_6(%arg0: i32) -> (i32, i32) {
    %c0_i32 = arith.constant 0 : i32
    %c0_i32_0 = arith.constant 0 : i32
    %c0_i32_1 = arith.constant 0 : i32
    return %c0_i32, %c0_i32_0 : i32, i32
  }
  func.func @transform_7(%arg0: i32) -> (i32, i32) {
    %c0_i32 = arith.constant 0 : i32
    %c0_i32_0 = arith.constant 0 : i32
    %c0_i32_1 = arith.constant 0 : i32
    return %c0_i32, %c0_i32_0 : i32, i32
  }
  func.func @transform_8(%arg0: i32) -> (i32, i32) {
    %c0_i32 = arith.constant 0 : i32
    %c0_i32_0 = arith.constant 0 : i32
    %c0_i32_1 = arith.constant 0 : i32
    return %c0_i32, %c0_i32_0 : i32, i32
  }
  func.func @transform_9(%arg0: i32) -> (i32, i32) {
    %c0_i32 = arith.constant 0 : i32
    %c0_i32_0 = arith.constant 0 : i32
    %c0_i32_1 = arith.constant 0 : i32
    return %c0_i32, %c0_i32_0 : i32, i32
  }
  func.func @transform_10(%arg0: i32) -> (i32, i32) {
    %c0_i32 = arith.constant 0 : i32
    %c0_i32_0 = arith.constant 0 : i32
    %c0_i32_1 = arith.constant 0 : i32
    return %c0_i32, %c0_i32_0 : i32, i32
  }
  func.func @transform_11(%arg0: i32) -> (i32, i32) {
    %c0_i32 = arith.constant 0 : i32
    %c0_i32_0 = arith.constant 0 : i32
    %c0_i32_1 = arith.constant 0 : i32
    return %c0_i32, %c0_i32_0 : i32, i32
  }
  func.func @transform_12(%arg0: i32) -> (i32, i32) {
    %c0_i32 = arith.constant 0 : i32
    %c0_i32_0 = arith.constant 0 : i32
    %c0_i32_1 = arith.constant 0 : i32
    return %c0_i32, %c0_i32_0 : i32, i32
  }
  func.func @transform_13(%arg0: i32) -> (i32, i32) {
    %c0_i32 = arith.constant 0 : i32
    %c0_i32_0 = arith.constant 0 : i32
    %c0_i32_1 = arith.constant 0 : i32
    return %c0_i32, %c0_i32_0 : i32, i32
  }
  func.func @transform_14(%arg0: i32) -> (i32, i32) {
    %c0_i32 = arith.constant 0 : i32
    %c0_i32_0 = arith.constant 0 : i32
    %c0_i32_1 = arith.constant 0 : i32
    return %c0_i32, %c0_i32_0 : i32, i32
  }
  func.func @transform_15(%arg0: i32) -> (i32, i32) {
    %c0_i32 = arith.constant 0 : i32
    %c0_i32_0 = arith.constant 0 : i32
    %c0_i32_1 = arith.constant 0 : i32
    return %c0_i32, %c0_i32_0 : i32, i32
  }
  func.func @transform_16(%arg0: i32) -> (i32, i32) {
    %c0_i32 = arith.constant 0 : i32
    %c0_i32_0 = arith.constant 0 : i32
    %c0_i32_1 = arith.constant 0 : i32
    return %c0_i32, %c0_i32_0 : i32, i32
  }
  func.func @transform_17(%arg0: i32) -> (i32, i32) {
    %c0_i32 = arith.constant 0 : i32
    %c0_i32_0 = arith.constant 0 : i32
    %c0_i32_1 = arith.constant 0 : i32
    return %c0_i32, %c0_i32_0 : i32, i32
  }
  func.func @transform_18(%arg0: i32) -> (i32, i32) {
    %c0_i32 = arith.constant 0 : i32
    %c0_i32_0 = arith.constant 0 : i32
    %c0_i32_1 = arith.constant 0 : i32
    return %c0_i32, %c0_i32_0 : i32, i32
  }
  func.func @transform_19(%arg0: i32) -> (i32, i32) {
    %c0_i32 = arith.constant 0 : i32
    %c0_i32_0 = arith.constant 0 : i32
    return %arg0, %c0_i32 : i32, i32
  }
}

</mosaic_0001>

<bundles_post_ra>
// kernel: tpu_custom_call.1
= control target key start
LH: loop header
LB: loop body
LE: loop exit
PB: predicated region body
PF: predicated region fallthrough
CT: control target
= control target key end

     0   :  { %s6664_s0 = inlined_call_operand.<no memory space> [shape: f32[1,1], index: 0, kind: input, shape index: {}]   ;;  %s6665_s1 = inlined_call_operand.hbm [shape: f32[8,16], index: 1, kind: input, shape index: {}]   ;;  %s6666_s2 = inlined_call_operand.hbm [shape: f32[8,16], index: 2, kind: input, shape index: {}]   ;;  %s6667_s3 = inlined_call_operand.hbm [shape: bf16[16,384], index: 3, kind: input, shape index: {}]   ;;  %s6668_s4 = inlined_call_operand.hbm [shape: f32[1,384], index: 4, kind: input, shape index: {}]   ;;  %s6669_s5 = inlined_call_operand.vmem [shape: bf16[384,384], index: 5, kind: input, shape index: {}]   ;;  %s6670_s6 = inlined_call_operand.hbm [shape: f32[1,384], index: 6, kind: input, shape index: {}]   ;;  %s6671_s7 = inlined_call_operand.vmem [shape: bf16[128,640], index: 7, kind: input, shape index: {}]   ;;  %s6672_s8 = inlined_call_operand.hbm [shape: f32[1,640], index: 8, kind: input, shape index: {}]   ;;  %s6673_s9 = inlined_call_operand.vmem [shape: bf16[16,512], index: 9, kind: input, shape index: {}]   ;;  %s6674_s10 = inlined_call_operand.vmem [shape: bf16[512,32], index: 10, kind: input, shape index: {}]   ;;  %s6675_s11 = inlined_call_operand.hbm [shape: bf16[128,1152], index: 11, kind: input, shape index: {}]   ;;  %s6676_s12 = inlined_call_operand.hbm [shape: f32[1,1152], index: 12, kind: input, shape index: {}]   ;;  %s6677_s13 = inlined_call_operand.hbm [shape: bf16[32,1024], index: 13, kind: input, shape index: {}]   ;;  %s6678_s14 = inlined_call_operand.vmem [shape: bf16[1024,32], index: 14, kind: input, shape index: {}]   ;;  %s6679_s15 = inlined_call_operand.vmem [shape: bf16[128,384], index: 15, kind: input, shape index: {}]   ;;  %s6680_s16 = inlined_call_operand.hbm [shape: f32[1,384], index: 16, kind: input, shape index: {}]   ;;  %s6681_s17 = inlined_call_operand.vmem [shape: bf16[32,256], index: 17, kind: input, shape index: {}]   ;;  %s6682_s18 = inlined_call_operand.vmem [shape: bf16[256,8], index: 18, kind: input, shape index: {}]   ;;  %s6683_s19 = inlined_call_operand.hbm [shape: f32[8,8], index: 19, kind: output, shape index: {}]  }
   0x1   :  { %6687 = sst [smem:[#allocation28_spill]] %s6664_s0 }
   0x2   :  { %6688 = sst [smem:[#allocation29_spill]] %s6665_s1 }
   0x3   :  { %6689 = sst [smem:[#allocation30_spill]] %s6666_s2 }
   0x4   :  { %6690 = sst [smem:[#allocation31_spill]] %s6667_s3 }
   0x5   :  { %25 = vsyncpa [#allocation4], 0 }
   0x6   :  { %26 = vsyncpa [#allocation7], 0 }
   0x7   :  { %27 = vsyncpa [#allocation10], 0 }
   0x8   :  { %28 = vsyncpa [#allocation13], 0 }
   0x9   :  { %29 = vsyncpa [#allocation16], 0 }
   0xa   :  { %30 = vsyncpa [#allocation19], 0 }
   0xb   :  { %31 = vsyncpa [#allocation5], 0  ;;  %s5433_s0 = smov [#allocation6]   ;;  %s5434_s20 = smov [#allocation9]  }
   0xc   :  { %s50_s30 = sshll.u32 %s5433_s0, 4  ;;  %s72_s21 = sshll.u32 %s5434_s20, 4  ;;  %s51_s30 = int_to_ptr.vmem [resolvable:$true] %s50_s30  ;;  %s73_s21 = int_to_ptr.vmem [resolvable:$true] %s72_s21 }
   0xd   :  { %s6691_s2 = sld [smem:[#allocation30_spill]] }
  0x13   :  { %s5177_s23 = scalar_lea.hbm %s6691_s2, 128 }
  0x14   :  { %p5178_p0 = scmp.ne.s32.totalorder %s6691_s2, %s5177_s23  ;;  %p5181_p1 = scmp.lt.u32.totalorder %s5177_s23, %s6691_s2 }
  0x16   :  { %p5183_p2 = pnand %p5181_p1, %p5178_p0 }
  0x18   :  { %5186 = shalt.err (!%p5183_p2)
}
  0x19   :  { %s5187_s27 = scalar_lea.vmem %s51_s30, 128  ;;  %p5192_p4 = scmp.lt.s32.totalorder %s51_s30, %s51_s30 }
  0x1a   :  { %p5188_p3 = scmp.ne.s32.totalorder %s51_s30, %s5187_s27  ;;  %p5193_p5 = scmp.lt.s32.totalorder %s5187_s27, %s5187_s27 }
  0x1c   :  { %p5194_p6 = por %p5193_p5, %p5192_p4 }
  0x1e   :  { %p5195_p7 = pnand %p5194_p6, %p5188_p3 }
  0x20   :  { %5198 = shalt.err (!%p5195_p7)
}
  0x21   :  { %53 = dma.hbm_to_vmem [thread:$0]  %s6691_s2, 128, %s51_s30, [#allocation7]  }
  0x22   :  { %s5199_s1 = scalar_lea.hbm %s6668_s4, 48 }
  0x23   :  { %p5200_p8 = scmp.ne.s32.totalorder %s6668_s4, %s5199_s1  ;;  %p5203_p9 = scmp.lt.u32.totalorder %s5199_s1, %s6668_s4 }
  0x25   :  { %p5205_p10 = pnand %p5203_p9, %p5200_p8 }
  0x27   :  { %5208 = shalt.err (!%p5205_p10)
}
  0x28   :  { %s5209_s3 = scalar_lea.vmem %s73_s21, 48  ;;  %s5213_s26 = scalar_lea.vmem %s73_s21, 64 }
  0x29   :  { %p5210_p11 = scmp.ne.s32.totalorder %s73_s21, %s5209_s3  ;;  %p5214_p12 = scmp.lt.s32.totalorder %s73_s21, %s73_s21 }
  0x2a   :  { %p5215_p13 = scmp.lt.s32.totalorder %s5213_s26, %s5209_s3 }
  0x2c   :  { %p5216_p0 = por %p5215_p13, %p5214_p12 }
  0x2e   :  { %p5217_p1 = pnand %p5216_p0, %p5210_p11 }
  0x30   :  { %5220 = shalt.err (!%p5217_p1)
}
  0x31   :  { %75 = dma.hbm_to_vmem [thread:$0]  %s6668_s4, 48, %s73_s21, [#allocation10]  }
  0x32   :  { %s5435_s27 = smov [#allocation12]   ;;  %s5436_s29 = smov [#allocation15]  }
  0x33   :  { %s96_s28 = sshll.u32 %s5435_s27, 4  ;;  %s122_s0 = sshll.u32 %s5436_s29, 4  ;;  %s97_s28 = int_to_ptr.vmem [resolvable:$true] %s96_s28  ;;  %s123_s0 = int_to_ptr.vmem [resolvable:$true] %s122_s0 }
  0x34   :  { %s5221_s22 = scalar_lea.hbm %s6672_s8, 80 }
  0x35   :  { %p5222_p2 = scmp.ne.s32.totalorder %s6672_s8, %s5221_s22  ;;  %p5225_p3 = scmp.lt.u32.totalorder %s5221_s22, %s6672_s8 }
  0x37   :  { %p5227_p4 = pnand %p5225_p3, %p5222_p2 }
  0x39   :  { %5230 = shalt.err (!%p5227_p4)
}
  0x3a   :  { %s5231_s4 = scalar_lea.vmem %s97_s28, 80  ;;  %s5235_s21 = scalar_lea.vmem %s97_s28, 96 }
  0x3b   :  { %p5232_p5 = scmp.ne.s32.totalorder %s97_s28, %s5231_s4  ;;  %p5236_p6 = scmp.lt.s32.totalorder %s97_s28, %s97_s28 }
  0x3c   :  { %p5237_p7 = scmp.lt.s32.totalorder %s5235_s21, %s5231_s4 }
  0x3e   :  { %p5238_p8 = por %p5237_p7, %p5236_p6 }
  0x40   :  { %p5239_p9 = pnand %p5238_p8, %p5232_p5 }
  0x42   :  { %5242 = shalt.err (!%p5239_p9)
}
  0x43   :  { %99 = dma.hbm_to_vmem [thread:$0]  %s6672_s8, 80, %s97_s28, [#allocation13]  }
  0x44   :  { %s5243_s29 = scalar_lea.hbm %s6676_s12, 144 }
  0x45   :  { %p5244_p10 = scmp.ne.s32.totalorder %s6676_s12, %s5243_s29  ;;  %p5247_p11 = scmp.lt.u32.totalorder %s5243_s29, %s6676_s12 }
  0x47   :  { %p5249_p12 = pnand %p5247_p11, %p5244_p10 }
  0x49   :  { %5252 = shalt.err (!%p5249_p12)
}
  0x4a   :  { %s5253_s23 = scalar_lea.vmem %s123_s0, 144  ;;  %s5257_s25 = scalar_lea.vmem %s123_s0, 160 }
  0x4b   :  { %p5254_p13 = scmp.ne.s32.totalorder %s123_s0, %s5253_s23  ;;  %p5258_p0 = scmp.lt.s32.totalorder %s123_s0, %s123_s0 }
  0x4c   :  { %p5259_p1 = scmp.lt.s32.totalorder %s5257_s25, %s5253_s23 }
  0x4e   :  { %p5260_p2 = por %p5259_p1, %p5258_p0 }
  0x50   :  { %p5261_p3 = pnand %p5260_p2, %p5254_p13 }
  0x52   :  { %5264 = shalt.err (!%p5261_p3)
}
  0x53   :  { %125 = dma.hbm_to_vmem [thread:$0]  %s6676_s12, 144, %s123_s0, [#allocation16]  }
  0x54   :  { %s5437_s3 = smov [#allocation3]   ;;  %s5438_s21 = smov [#allocation8]  }
  0x55   :  { %s40_s4 = sshll.u32 %s5437_s3, 4  ;;  %s59_s26 = sshll.u32 %s5438_s21, 4  ;;  %s41_s4 = int_to_ptr.vmem [resolvable:$true] %s40_s4  ;;  %s5603_s26 = int_to_ptr.vmem [resolvable:$true] %s59_s26 }
  0x56   :  { %s6692_s27 = sld [smem:[#allocation29_spill]] }
  0x5c   :  { %s5265_s29 = scalar_lea.hbm %s6692_s27, 128 }
  0x5d   :  { %p5266_p4 = scmp.ne.s32.totalorder %s6692_s27, %s5265_s29  ;;  %p5269_p5 = scmp.lt.u32.totalorder %s5265_s29, %s6692_s27 }
  0x5f   :  { %p5271_p6 = pnand %p5269_p5, %p5266_p4 }
  0x61   :  { %5274 = shalt.err (!%p5271_p6)
}
  0x62   :  { %s5275_s12 = scalar_lea.vmem %s41_s4, 128  ;;  %p5280_p8 = scmp.lt.s32.totalorder %s41_s4, %s41_s4 }
  0x63   :  { %p5276_p7 = scmp.ne.s32.totalorder %s41_s4, %s5275_s12  ;;  %p5281_p9 = scmp.lt.s32.totalorder %s5275_s12, %s5275_s12 }
  0x65   :  { %p5282_p10 = por %p5281_p9, %p5280_p8 }
  0x67   :  { %p5283_p11 = pnand %p5282_p10, %p5276_p7 }
  0x69   :  { %5286 = shalt.err (!%p5283_p11)
}
  0x6a   :  { %43 = dma.hbm_to_vmem [thread:$0]  %s6692_s27, 128, %s41_s4, [#allocation4]  }
  0x6b   :  { %s6693_s28 = sld [smem:[#allocation31_spill]] }
  0x71   :  { %s5287_s3 = scalar_lea.hbm %s6693_s28, 384 }
  0x72   :  { %p5288_p12 = scmp.ne.s32.totalorder %s6693_s28, %s5287_s3  ;;  %p5291_p13 = scmp.lt.u32.totalorder %s5287_s3, %s6693_s28 }
  0x74   :  { %p5293_p0 = pnand %p5291_p13, %p5288_p12 }
  0x76   :  { %5296 = shalt.err (!%p5293_p0)
}
  0x77   :  { %s5297_s20 = scalar_lea.vmem %s5603_s26, 384  ;;  %p5302_p2 = scmp.lt.s32.totalorder %s5603_s26, %s5603_s26 }
  0x78   :  { %p5298_p1 = scmp.ne.s32.totalorder %s5603_s26, %s5297_s20  ;;  %p5303_p3 = scmp.lt.s32.totalorder %s5297_s20, %s5297_s20 }
  0x7a   :  { %p5304_p4 = por %p5303_p3, %p5302_p2 }
  0x7c   :  { %p5305_p5 = pnand %p5304_p4, %p5298_p1 }
  0x7e   :  { %5308 = shalt.err (!%p5305_p5)
}
  0x7f   :  { %s5439_s4 = smov 192   ;;  %s5440_s27 = smov 12  }
  0x80   :  { %65 = dma.hbm_to_vmem [thread:$0]  %s6693_s28, 384, %s5603_s26, [#allocation7], %s5439_s4, %s5439_s4, %s5440_s27  }
  0x81   :  { %s5441_s24 = smov [#allocation11]   ;;  %s5442_s0 = smov [#allocation14]  }
  0x82   :  { %s84_s12 = sshll.u32 %s5441_s24, 4  ;;  %s109_s23 = sshll.u32 %s5442_s0, 4  ;;  %s85_s12 = int_to_ptr.vmem [resolvable:$true] %s84_s12  ;;  %s5634_s23 = int_to_ptr.vmem [resolvable:$true] %s109_s23 }
  0x83   :  { %s5309_s3 = scalar_lea.hbm %s6670_s6, 48 }
  0x84   :  { %p5310_p6 = scmp.ne.s32.totalorder %s6670_s6, %s5309_s3  ;;  %p5313_p7 = scmp.lt.u32.totalorder %s5309_s3, %s6670_s6 }
  0x86   :  { %p5315_p8 = pnand %p5313_p7, %p5310_p6 }
  0x88   :  { %5318 = shalt.err (!%p5315_p8)
}
  0x89   :  { %s5319_s26 = scalar_lea.vmem %s85_s12, 48  ;;  %s5323_s28 = scalar_lea.vmem %s85_s12, 64 }
  0x8a   :  { %p5320_p9 = scmp.ne.s32.totalorder %s85_s12, %s5319_s26  ;;  %p5324_p10 = scmp.lt.s32.totalorder %s85_s12, %s85_s12 }
  0x8b   :  { %p5325_p11 = scmp.lt.s32.totalorder %s5323_s28, %s5319_s26 }
  0x8d   :  { %p5326_p12 = por %p5325_p11, %p5324_p10 }
  0x8f   :  { %p5327_p13 = pnand %p5326_p12, %p5320_p9 }
  0x91   :  { %5330 = shalt.err (!%p5327_p13)
}
  0x92   :  { %87 = dma.hbm_to_vmem [thread:$0]  %s6670_s6, 48, %s85_s12, [#allocation10]  }
  0x93   :  { %s5331_s22 = scalar_lea.hbm %s6675_s11, 9216 }
  0x94   :  { %p5332_p0 = scmp.ne.s32.totalorder %s6675_s11, %s5331_s22  ;;  %p5335_p1 = scmp.lt.u32.totalorder %s5331_s22, %s6675_s11 }
  0x96   :  { %p5337_p2 = pnand %p5335_p1, %p5332_p0 }
  0x98   :  { %5340 = shalt.err (!%p5337_p2)
}
  0x99   :  { %s5341_s3 = scalar_lea.vmem %s5634_s23, 9216  ;;  %p5346_p4 = scmp.lt.s32.totalorder %s5634_s23, %s5634_s23 }
  0x9a   :  { %p5342_p3 = scmp.ne.s32.totalorder %s5634_s23, %s5341_s3  ;;  %p5347_p5 = scmp.lt.s32.totalorder %s5341_s3, %s5341_s3 }
  0x9c   :  { %p5348_p6 = por %p5347_p5, %p5346_p4 }
  0x9e   :  { %p5349_p7 = pnand %p5348_p6, %p5342_p3 }
  0xa0   :  { %5352 = shalt.err (!%p5349_p7)
}
  0xa1   :  { %s5443_s6 = smov 576   ;;  %s5444_s12 = smov 36  }
  0xa2   :  { %115 = dma.hbm_to_vmem [thread:$0]  %s6675_s11, 9216, %s5634_s23, [#allocation13], %s5443_s6, %s5443_s6, %s5444_s12  }
  0xa3   :  { %s5445_s2 = smov [#allocation17]   ;;  %s5353_s20 = scalar_lea.hbm %s6677_s13, 2048 }
  0xa4   :  { %s131_s29 = sshll.u32 %s5445_s2, 4  ;;  %p5354_p8 = scmp.ne.s32.totalorder %s6677_s13, %s5353_s20  ;;  %s132_s29 = int_to_ptr.vmem [resolvable:$true] %s131_s29 }
  0xa5   :  { %p5357_p9 = scmp.lt.u32.totalorder %s5353_s20, %s6677_s13 }
  0xa7   :  { %p5359_p10 = pnand %p5357_p9, %p5354_p8 }
  0xa9   :  { %5362 = shalt.err (!%p5359_p10)
}
  0xaa   :  { %s5363_s24 = scalar_lea.vmem %s132_s29, 2048  ;;  %p5368_p12 = scmp.lt.s32.totalorder %s132_s29, %s132_s29 }
  0xab   :  { %p5364_p11 = scmp.ne.s32.totalorder %s132_s29, %s5363_s24  ;;  %p5369_p13 = scmp.lt.s32.totalorder %s5363_s24, %s5363_s24 }
  0xad   :  { %p5370_p0 = por %p5369_p13, %p5368_p12 }
  0xaf   :  { %p5371_p1 = pnand %p5370_p0, %p5364_p11 }
  0xb1   :  { %5374 = shalt.err (!%p5371_p1)
}
  0xb2   :  { %s5446_s11 = smov 512   ;;  %s5447_s23 = smov 32  }
  0xb3   :  { %137 = dma.hbm_to_vmem [thread:$0]  %s6677_s13, 2048, %s132_s29, [#allocation16], %s5446_s11, %s5446_s11, %s5447_s23  }
  0xb4   :  { %s5448_s8 = smov [#allocation18]   ;;  %s5375_s21 = scalar_lea.hbm %s6680_s16, 48 }
  0xb5   :  { %s148_s3 = sshll.u32 %s5448_s8, 4  ;;  %p5376_p2 = scmp.ne.s32.totalorder %s6680_s16, %s5375_s21  ;;  %s149_s3 = int_to_ptr.vmem [resolvable:$true] %s148_s3 }
  0xb6   :  { %p5379_p3 = scmp.lt.u32.totalorder %s5375_s21, %s6680_s16 }
  0xb8   :  { %p5381_p4 = pnand %p5379_p3, %p5376_p2 }
  0xba   :  { %5384 = shalt.err (!%p5381_p4)
}
  0xbb   :  { %s5385_s20 = scalar_lea.vmem %s149_s3, 48  ;;  %s5389_s13 = scalar_lea.vmem %s149_s3, 64 }
  0xbc   :  { %p5386_p5 = scmp.ne.s32.totalorder %s149_s3, %s5385_s20  ;;  %p5390_p6 = scmp.lt.s32.totalorder %s149_s3, %s149_s3 }
  0xbd   :  { %p5391_p7 = scmp.lt.s32.totalorder %s5389_s13, %s5385_s20 }
  0xbf   :  { %p5392_p8 = por %p5391_p7, %p5390_p6 }
  0xc1   :  { %p5393_p9 = pnand %p5392_p8, %p5386_p5 }
  0xc3   :  { %5396 = shalt.err (!%p5393_p9)
}
  0xc4   :  { %151 = dma.hbm_to_vmem [thread:$0]  %s6680_s16, 48, %s149_s3, [#allocation19]  }
  0xc5   :  { %5419 = dma.done.wait [#allocation4], 128  }
  0xc6   :  { %5420 = vsyncadd [#allocation4], 4294967168 }
  0xc7   :  { %5421 = dma.done.wait [#allocation7], 512  }
  0xc8   :  { %5422 = vsyncadd [#allocation7], 4294966784 }
  0xc9   :  { %5423 = dma.done.wait [#allocation10], 96  }
  0xca   :  { %5424 = vsyncadd [#allocation10], 4294967200 }
  0xcb   :  { %5425 = dma.done.wait [#allocation13], 9296  }
  0xcc   :  { %5426 = vsyncadd [#allocation13], 4294958000 }
  0xcd   :  { %5427 = dma.done.wait [#allocation16], 2192  }
  0xce   :  { %5428 = vsyncadd [#allocation16], 4294965104 }
  0xcf   :  { %5429 = dma.done.wait [#allocation19], 48  }
  0xd0   :  { %5430 = vsyncadd [#allocation19], 4294967248  ;;  %v5449_v0 = vmov 0   ;;  %s5450_s27 = smov 0.0   ;;  %s6694_s24 = sld [smem:[#allocation28_spill]]  ;;  %v5452_v1 = vmov 0.0   ;;  %v205_v62 = vlaneseq }
  0xd1   :  { %272 = vmatprep.mubr.bf16.mxu0 %v5449_v0  ;;  %s5451_s11 = smov 1.0   ;;  %4626 = vmatprep.subr.bf16.mxu1 %v5452_v1  ;;  %vm5453_vm0 = vmmov 0   ;;  %v4740_v4 = vld [vmem:[#allocation8 + $0x4] ss:$12 sps:$4 sm:$0xff]   ;;  %v4742_v5 = vld [vmem:[#allocation8] ss:$12 sps:$4 sm:$0xff]  }
  0xd2   :  { %4628 = vmatprep.mubr.msk.bf16.mxu1 %vm5453_vm0, %v5452_v1  ;;  %v190_v6 = vld [vmem:[#allocation6] sm:$0xff]  ;;  %v191_v7 = vld [vmem:[#allocation3] sm:$0xff]  ;;  %240 = vmatprep.subr.bf16.mxu0 %v4740_v4  ;;  %vm236_vm1 = vcmask 130048   ;;  %v4750_v18 = vld [vmem:[%s6669_s5 + $0x30] ss:$12 sps:$4 sm:$0xff]   ;;  %v5846_v63 = vshrl.u32 %v205_v62, 7 }
  0xd3   :  { %v4743_v10 = vld [vmem:[#allocation8 + $0x8] ss:$12 sps:$4 sm:$0xff]   ;;  %241 = vmatpush1.bf16.msra.mxu0 %v4742_v5  ;;  %v4744_v13 = vld [vmem:[%s6669_s5] ss:$12 sps:$4 sm:$0xff]   ;;  %v4749_v15 = vld [vmem:[%s6669_s5 + $0x1c] ss:$12 sps:$4 sm:$0xff]  }
  0xd4   :  { %4627 = vmatpush3.bf16.msra.mxu1 %v4743_v10  ;;  %v4746_v12 = vld [vmem:[%s6669_s5 + $0x4] ss:$12 sps:$4 sm:$0xff]   ;;  %v4752_v17 = vld [vmem:[%s6669_s5 + $0x34] ss:$12 sps:$4 sm:$0xff]   ;;  %v4755_v19 = vld [vmem:[%s6669_s5 + $0x4c] ss:$12 sps:$4 sm:$0xff]  }
  0xd5   :  { %824 = vmatprep.subr.bf16.mxu0 %v4746_v12  ;;  %v4747_v16 = vld [vmem:[%s6669_s5 + $0x18] ss:$12 sps:$4 sm:$0xff]   ;;  %v4771_v20 = vld [vmem:[%s6669_s5 + $0xc8] ss:$12 sps:$4 sm:$0xff]   ;;  %v4776_v24 = vld [vmem:[%s6669_s5 + $0xe0] ss:$12 sps:$4 sm:$0xff]  }
  0xd6   :  { %s188_s16 = smax.f32 %s5450_s27, %s6694_s24  ;;  %v4772_v21 = vld [vmem:[%s6669_s5 + $0x8] ss:$12 sps:$4 sm:$0xff]   ;;  %4414 = vmatprep.subr.bf16.mxu1 %v4771_v20  ;;  %v4758_v23 = vld [vmem:[%s6669_s5 + $0x64] ss:$12 sps:$4 sm:$0xff]   ;;  %v4777_v25 = vld [vmem:[%s6669_s5 + $0x20] ss:$12 sps:$4 sm:$0xff]  }
  0xd7   :  { %s189_s23 = smin.f32 %s5451_s11, %s188_s16  ;;  %v4753_v22 = vld [vmem:[%s6669_s5 + $0x48] ss:$12 sps:$4 sm:$0xff]   ;;  %v4756_v26 = vld [vmem:[%s6669_s5 + $0x60] ss:$12 sps:$4 sm:$0xff]   ;;  %v4781_v28 = vld [vmem:[%s6669_s5 + $0xf8] ss:$12 sps:$4 sm:$0xff]  }
  0xd8   :  { %s194_s0 = ssub.f32 1.0, %s189_s23  ;;  %v192_v2 = vstv %s189_s23  ;;  %v4761_v27 = vld [vmem:[%s6669_s5 + $0x7c] ss:$12 sps:$4 sm:$0xff]   ;;  %v4782_v29 = vld [vmem:[%s6669_s5 + $0x38] ss:$12 sps:$4 sm:$0xff]   ;;  %v5852_v4 = vsub.s32 1, %v5846_v63 }
  0xd9   :  { %v193_v8 = vmul.f32 %v192_v2, %v191_v7  ;;  %v4759_v30 = vld [vmem:[%s6669_s5 + $0x78] ss:$12 sps:$4 sm:$0xff]   ;;  %v4764_v31 = vld [vmem:[%s6669_s5 + $0x94] ss:$12 sps:$4 sm:$0xff]   ;;  %v4786_v32 = vld [vmem:[%s6669_s5 + $0x110] ss:$12 sps:$4 sm:$0xff]  }
  0xda   :  { %v195_v3 = vstv %s194_s0  ;;  %v4787_v33 = vld [vmem:[%s6669_s5 + $0x50] ss:$12 sps:$4 sm:$0xff]   ;;  %v4767_v35 = vld [vmem:[%s6669_s5 + $0xac] ss:$12 sps:$4 sm:$0xff]   ;;  %v4765_v36 = vld [vmem:[%s6669_s5 + $0xa8] ss:$12 sps:$4 sm:$0xff]  }
  0xdb   :  { %v196_v9 = vmul.f32 %v195_v3, %v190_v6  ;;  %v4762_v34 = vld [vmem:[%s6669_s5 + $0x90] ss:$12 sps:$4 sm:$0xff]   ;;  %v4768_v38 = vld [vmem:[%s6669_s5 + $0xc0] ss:$12 sps:$4 sm:$0xff]   ;;  %v4773_v40 = vld [vmem:[%s6669_s5 + $0xd8] ss:$12 sps:$4 sm:$0xff]  }
  0xdc   :  { %v4770_v37 = vld [vmem:[%s6669_s5 + $0xc4] ss:$12 sps:$4 sm:$0xff]   ;;  %v4775_v39 = vld [vmem:[%s6669_s5 + $0xdc] ss:$12 sps:$4 sm:$0xff]   ;;  %v4780_v41 = vld [vmem:[%s6669_s5 + $0xf4] ss:$12 sps:$4 sm:$0xff]  }
  0xdd   :  { %v197_v11 = vadd.f32 %v196_v9, %v193_v8  ;;  %v4778_v42 = vld [vmem:[%s6669_s5 + $0xf0] ss:$12 sps:$4 sm:$0xff]   ;;  %v4785_v43 = vld [vmem:[%s6669_s5 + $0x10c] ss:$12 sps:$4 sm:$0xff]   ;;  %v4783_v44 = vld [vmem:[%s6669_s5 + $0x108] ss:$12 sps:$4 sm:$0xff]  }
  0xde   :  { %v4790_v45 = vld [vmem:[%s6669_s5 + $0x124] ss:$12 sps:$4 sm:$0xff]   ;;  %v4791_v46 = vld [vmem:[%s6669_s5 + $0x128] ss:$12 sps:$4 sm:$0xff]   ;;  %v4788_v47 = vld [vmem:[%s6669_s5 + $0x120] ss:$12 sps:$4 sm:$0xff]  }
  0xdf   :  { %v203_v14 = vpack.c.bf16 %v197_v11, %v197_v11  ;;  %v4792_v48 = vld [vmem:[%s6669_s5 + $0x68] ss:$12 sps:$4 sm:$0xff]   ;;  %v4796_v50 = vld [vmem:[%s6669_s5 + $0x140] ss:$12 sps:$4 sm:$0xff]   ;;  %v4793_v51 = vld [vmem:[%s6669_s5 + $0x138] ss:$12 sps:$4 sm:$0xff]  }
  0xe0   :  { %v4795_v49 = vld [vmem:[%s6669_s5 + $0x13c] ss:$12 sps:$4 sm:$0xff]   ;;  %v4797_v52 = vld [vmem:[%s6669_s5 + $0x80] ss:$12 sps:$4 sm:$0xff]   ;;  %v4801_v54 = vld [vmem:[%s6669_s5 + $0x158] ss:$12 sps:$4 sm:$0xff]  }
  0xe1   :  { %4058 = vmatmul.mubr.msk.bf16.vlgmr.msra.gmra.mrb[0].mxu0 %vm236_vm1, %v203_v14  ;;  %4629 = vmatmul.mubr.msk.bf16.vlgmr.msra.gmra.mrb[0].mxu1 %vm236_vm1, %v203_v14  ;;  %v4800_v53 = vld [vmem:[%s6669_s5 + $0x154] ss:$12 sps:$4 sm:$0xff]   ;;  %v4798_v55 = vld [vmem:[%s6669_s5 + $0x150] ss:$12 sps:$4 sm:$0xff]   ;;  %v4802_v56 = vld [vmem:[%s6669_s5 + $0x98] ss:$12 sps:$4 sm:$0xff]  }
  0xe2   :  { %825 = vmatpush1.bf16.msra.mxu0 %v4744_v13  ;;  %4415 = vmatpush3.bf16.msra.mxu1 %v4772_v21  ;;  %v4805_v57 = vld [vmem:[%s6669_s5 + $0x16c] ss:$12 sps:$4 sm:$0xff]   ;;  %v4806_v58 = vld [vmem:[%s6669_s5 + $0x170] ss:$12 sps:$4 sm:$0xff]   ;;  %v4803_v59 = vld [vmem:[%s6669_s5 + $0x168] ss:$12 sps:$4 sm:$0xff]  }
  0xe3   :  { %826 = vmatprep.subr.bf16.mxu0 %v4749_v15  ;;  %4416 = vmatprep.subr.bf16.mxu1 %v4776_v24  ;;  %v4807_v60 = vld [vmem:[%s6669_s5 + $0xb0] ss:$12 sps:$4 sm:$0xff]   ;;  %v5849_v2 = vsub.s32 0, %v5846_v63  ;;  %v202_v3 = vld [vmem:[#allocation9] sm:$0x7]  ;;  %vm2990_vm2 = vcmask 261120  }
  0xe4   :  { %v4810_v61 = vld [vmem:[%s6669_s5 + $0x184] ss:$12 sps:$4 sm:$0xff]   ;;  %v212_v6 = vrot.slane %v202_v3, %v5852_v4  ;;  %v4808_v20 = vld [vmem:[%s6669_s5 + $0x180] ss:$12 sps:$4 sm:$0xff]   ;;  %v4811_v21 = vld [vmem:[%s6669_s5 + $0x188] ss:$12 sps:$4 sm:$0xff]  }
  0xe5   :  { %v208_v5 = vrot.slane %v202_v3, %v5849_v2  ;;  %v4812_v24 = vld [vmem:[%s6669_s5 + $0x198] ss:$12 sps:$4 sm:$0xff]   ;;  %vm4033_vm3 = vcmask 64512  }
  0xe6   :  { %827 = vmatpush1.bf16.msra.mxu0 %v4747_v16  ;;  %4417 = vmatpush3.bf16.msra.mxu1 %v4777_v25  ;;  %v4815_v25 = vld [vmem:[%s6669_s5 + $0x1a0] ss:$12 sps:$4 sm:$0xff]   ;;  %v4863_v62 = vld [vmem:[%s6671_s7 + $0x84] ss:$20 sps:$4 sm:$0xff]  }
  0xe7   :  { %828 = vmatprep.subr.bf16.mxu0 %v4752_v17  ;;  %4418 = vmatprep.subr.bf16.mxu1 %v4781_v28  ;;  %v4816_v28 = vld [vmem:[%s6669_s5 + $0x1b0] ss:$12 sps:$4 sm:$0xff]  }
  0xea   :  { %829 = vmatpush1.bf16.msra.mxu0 %v4750_v18  ;;  %4419 = vmatpush3.bf16.msra.mxu1 %v4782_v29  ;;  %v4819_v29 = vld [vmem:[%s6669_s5 + $0x1b8] ss:$12 sps:$4 sm:$0xff]  }
  0xeb   :  { %830 = vmatprep.subr.bf16.mxu0 %v4755_v19  ;;  %4420 = vmatprep.subr.bf16.mxu1 %v4786_v32  ;;  %v4820_v32 = vld [vmem:[%s6669_s5 + $0x1c8] ss:$12 sps:$4 sm:$0xff]  }
  0xee   :  { %831 = vmatpush1.bf16.msra.mxu0 %v4753_v22  ;;  %4421 = vmatpush3.bf16.msra.mxu1 %v4787_v33  ;;  %v4823_v33 = vld [vmem:[%s6669_s5 + $0x1d0] ss:$12 sps:$4 sm:$0xff]  }
  0xef   :  { %832 = vmatprep.subr.bf16.mxu0 %v4758_v23  ;;  %4422 = vmatprep.subr.bf16.mxu1 %v4791_v46  ;;  %v4814_v23 = vld [vmem:[%s6669_s5 + $0x19c] ss:$12 sps:$4 sm:$0xff]  }
  0xf0   :  { %v4836_v46 = vld [vmem:[%s6669_s5 + $0x228] ss:$12 sps:$4 sm:$0xff]  }
  0xf2   :  { %833 = vmatpush1.bf16.msra.mxu0 %v4756_v26  ;;  %4423 = vmatpush3.bf16.msra.mxu1 %v4792_v48  ;;  %v4818_v26 = vld [vmem:[%s6669_s5 + $0x1b4] ss:$12 sps:$4 sm:$0xff]  }
  0xf3   :  { %834 = vmatprep.subr.bf16.mxu0 %v4761_v27  ;;  %4424 = vmatprep.subr.bf16.mxu1 %v4796_v50  ;;  %v5876_v27 = vsub.s32 2, %v5846_v63  ;;  %v4842_v50 = vld [vmem:[%s6671_s7 + $0x4] ss:$20 sps:$4 sm:$0xff]  }
  0xf6   :  { %835 = vmatpush1.bf16.msra.mxu0 %v4759_v30  ;;  %4425 = vmatpush3.bf16.msra.mxu1 %v4797_v52  ;;  %v4822_v30 = vld [vmem:[%s6669_s5 + $0x1cc] ss:$12 sps:$4 sm:$0xff]  }
  0xf7   :  { %836 = vmatprep.subr.bf16.mxu0 %v4764_v31  ;;  %4426 = vmatprep.subr.bf16.mxu1 %v4801_v54  ;;  %v216_v31 = vrot.slane %v202_v3, %v5876_v27  ;;  %v4845_v52 = vld [vmem:[%s6671_s7 + $0xc] ss:$20 sps:$4 sm:$0xff]   ;;  %v4851_v54 = vld [vmem:[%s6671_s7 + $0x34] ss:$20 sps:$4 sm:$0xff]  }
  0xf8   :  { %v4858_v3 = vld [vmem:[%s6671_s7 + $0x78] ss:$20 sps:$4 sm:$0xff]  }
  0xfa   :  { %837 = vmatpush1.bf16.msra.mxu0 %v4762_v34  ;;  %4427 = vmatpush3.bf16.msra.mxu1 %v4802_v56  ;;  %v4826_v34 = vld [vmem:[%s6669_s5 + $0x1e4] ss:$12 sps:$4 sm:$0xff]  }
  0xfb   :  { %838 = vmatprep.subr.bf16.mxu0 %v4767_v35  ;;  %4428 = vmatprep.subr.bf16.mxu1 %v4806_v58  ;;  %v4849_v56 = vld [vmem:[%s6671_s7 + $0x30] ss:$20 sps:$4 sm:$0xff]  }
  0xfc   :  { %v4857_v58 = vld [vmem:[%s6671_s7 + $0x5c] ss:$20 sps:$4 sm:$0xff]  }
  0xfe   :  { %839 = vmatpush1.bf16.msra.mxu0 %v4765_v36  ;;  %4429 = vmatpush3.bf16.msra.mxu1 %v4807_v60  ;;  %v4824_v36 = vld [vmem:[%s6669_s5 + $0x1e0] ss:$12 sps:$4 sm:$0xff]  }
  0xff   :  { %840 = vmatprep.subr.bf16.mxu0 %v4770_v37  ;;  %4632 = vmatprep.subr.bf16.mxu1 %v5452_v1  ;;  %v4827_v37 = vld [vmem:[%s6669_s5 + $0x1e8] ss:$12 sps:$4 sm:$0xff]   ;;  %v4855_v60 = vld [vmem:[%s6671_s7 + $0x58] ss:$20 sps:$4 sm:$0xff]  }
 0x102   :  { %841 = vmatpush1.bf16.msra.mxu0 %v4768_v38  ;;  %v4830_v38 = vld [vmem:[%s6669_s5 + $0x1fc] ss:$12 sps:$4 sm:$0xff]  }
 0x103   :  { %842 = vmatprep.subr.bf16.mxu0 %v4775_v39  ;;  %v4828_v39 = vld [vmem:[%s6669_s5 + $0x1f8] ss:$12 sps:$4 sm:$0xff]  }
 0x106   :  { %843 = vmatpush1.bf16.msra.mxu0 %v4773_v40  ;;  %v4831_v40 = vld [vmem:[%s6669_s5 + $0x200] ss:$12 sps:$4 sm:$0xff]  }
 0x107   :  { %844 = vmatprep.subr.bf16.mxu0 %v4780_v41  ;;  %v4834_v41 = vld [vmem:[%s6669_s5 + $0x214] ss:$12 sps:$4 sm:$0xff]  }
 0x10a   :  { %845 = vmatpush1.bf16.msra.mxu0 %v4778_v42  ;;  %v4832_v42 = vld [vmem:[%s6669_s5 + $0x210] ss:$12 sps:$4 sm:$0xff]  }
 0x10b   :  { %846 = vmatprep.subr.bf16.mxu0 %v4785_v43  ;;  %v4835_v43 = vld [vmem:[%s6669_s5 + $0x218] ss:$12 sps:$4 sm:$0xff]  }
 0x10e   :  { %847 = vmatpush1.bf16.msra.mxu0 %v4783_v44  ;;  %v4838_v44 = vld [vmem:[%s6669_s5 + $0x22c] ss:$12 sps:$4 sm:$0xff]  }
 0x10f   :  { %848 = vmatprep.subr.bf16.mxu0 %v4790_v45 }
 0x112   :  { %849 = vmatpush1.bf16.msra.mxu0 %v4788_v47  ;;  %v4839_v47 = vld [vmem:[%s6669_s5 + $0x230] ss:$12 sps:$4 sm:$0xff]  }
 0x113   :  { %850 = vmatprep.subr.bf16.mxu0 %v4795_v49  ;;  %v4840_v49 = vld [vmem:[%s6671_s7] ss:$20 sps:$4 sm:$0xff]  }
 0x116   :  { %851 = vmatpush1.bf16.msra.mxu0 %v4793_v51  ;;  %v4843_v51 = vld [vmem:[%s6671_s7 + $0x8] ss:$20 sps:$4 sm:$0xff]  }
 0x117   :  { %852 = vmatprep.subr.bf16.mxu0 %v4800_v53  ;;  %v4848_v53 = vld [vmem:[%s6671_s7 + $0x2c] ss:$20 sps:$4 sm:$0xff]  }
 0x11a   :  { %853 = vmatpush1.bf16.msra.mxu0 %v4798_v55  ;;  %v4846_v55 = vld [vmem:[%s6671_s7 + $0x28] ss:$20 sps:$4 sm:$0xff]  }
 0x11b   :  { %854 = vmatprep.subr.bf16.mxu0 %v4805_v57  ;;  %v4854_v57 = vld [vmem:[%s6671_s7 + $0x54] ss:$20 sps:$4 sm:$0xff]  }
 0x11e   :  { %855 = vmatpush1.bf16.msra.mxu0 %v4803_v59  ;;  %v4852_v59 = vld [vmem:[%s6671_s7 + $0x50] ss:$20 sps:$4 sm:$0xff]  }
 0x11f   :  { %865 = vmatprep.subr.bf16.mxu0 %v4810_v61  ;;  %v4860_v61 = vld [vmem:[%s6671_s7 + $0x7c] ss:$20 sps:$4 sm:$0xff]  }
 0x1b4   :  { %v274_v7 = vpop.f32.mrb[0].mxu0  ;;  %v315_v8 = vpop.f32.mrb[0].mxu1 }
 0x1b5   :  { %v275_v9 = vadd.f32 %v274_v7, %v208_v5  ;;  %v276_v10 = vpop.f32.mrb[1].mxu0  ;;  %v4630_v11 = vpop.f32.mrb[1].mxu1  ;;  %v316_v35 = vadd.f32 %v315_v8, %v216_v31  ;;  %v4861_v5 = vld [vmem:[%s6671_s7 + $0x80] ss:$20 sps:$4 sm:$0xff]  }
 0x1b6   :  { %v277_v12 = vadd.f32 %v276_v10, %v212_v6  ;;  %v278_v13 = vpop.f32.mrb[2].mxu0  ;;  %v318_v14 = vpop.f32.mrb[2].mxu1  ;;  %v4866_v6 = vld [vmem:[%s6671_s7 + $0xa4] ss:$20 sps:$4 sm:$0xff]   ;;  %v4869_v7 = vld [vmem:[%s6671_s7 + $0xac] ss:$20 sps:$4 sm:$0xff]  }
 0x1b7   :  { %5156 = vtanh.f32 %v275_v9  ;;  %v279_v15 = vpop.f32.mrb[3].mxu0  ;;  %v4631_v16 = vpop.f32.mrb[3].mxu1  ;;  %v4864_v8 = vld [vmem:[%s6671_s7 + $0xa0] ss:$20 sps:$4 sm:$0xff]   ;;  %v4867_v9 = vld [vmem:[%s6671_s7 + $0xa8] ss:$20 sps:$4 sm:$0xff]  }
 0x1b8   :  { %5158 = vtanh.f32 %v277_v12  ;;  %v4872_v10 = vld [vmem:[%s6671_s7 + $0xcc] ss:$20 sps:$4 sm:$0xff]   ;;  %v4875_v11 = vld [vmem:[%s6671_s7 + $0xd4] ss:$20 sps:$4 sm:$0xff]   ;;  %v4873_v13 = vld [vmem:[%s6671_s7 + $0xd0] ss:$20 sps:$4 sm:$0xff]  }
 0x1b9   :  { %5160 = vtanh.f32 %v316_v35  ;;  %v4870_v12 = vld [vmem:[%s6671_s7 + $0xc8] ss:$20 sps:$4 sm:$0xff]   ;;  %v4876_v16 = vld [vmem:[%s6671_s7 + $0xf0] ss:$20 sps:$4 sm:$0xff]  }
 0x1ba   :  { %v4878_v14 = vld [vmem:[%s6671_s7 + $0xf4] ss:$20 sps:$4 sm:$0xff]   ;;  %v4881_v15 = vld [vmem:[%s6671_s7 + $0xfc] ss:$20 sps:$4 sm:$0xff]  }
 0x1c1   :  { %v5157_v17 = vpop.eup %5156 }
 0x1c2   :  { %v5159_v18 = vpop.eup %5158  ;;  %v421_v22 = vpack.c.bf16 %v5157_v17, %v5157_v17  ;;  %v4879_v17 = vld [vmem:[%s6671_s7 + $0xf8] ss:$20 sps:$4 sm:$0xff]  }
 0x1c3   :  { %v422_v19 = vpack.c.bf16 %v5159_v18, %v5159_v18  ;;  %v5161_v45 = vpop.eup %5160  ;;  %v4884_v18 = vld [vmem:[%s6671_s7 + $0x11c] ss:$20 sps:$4 sm:$0xff]  }
 0x1c4   :  { %v423_v48 = vpack.c.bf16 %v5161_v45, %v5161_v45  ;;  %v4891_v45 = vld [vmem:[%s6671_s7 + $0x10] ss:$20 sps:$4 sm:$0xff]  }
 0x1c5   :  { %856 = vmatprep.mubr.bf16.mxu0 %v422_v19  ;;  %938 = vmatprep.mubr.bf16.mxu1 %v422_v19  ;;  %v4887_v19 = vld [vmem:[%s6671_s7 + $0x124] ss:$20 sps:$4 sm:$0xff]  }
 0x1c6   :  { %857 = vmatmul.mubr.bf16.vlgmr.msra.gmra.mrb[4].mxu0 %v421_v22  ;;  %939 = vmatmul.mubr.bf16.vlgmr.msra.gmra.mrb[4].mxu1 %v421_v22  ;;  %v4890_v22 = vld [vmem:[#allocation14 + $0x4] ss:$36 sps:$4 sm:$0xff]  }
 0x1c7   :  { %866 = vmatpush1.bf16.msra.mxu0 %v4808_v20  ;;  %4633 = vmatpush3.bf16.msra.mxu1 %v4811_v21  ;;  %v4882_v20 = vld [vmem:[%s6671_s7 + $0x118] ss:$20 sps:$4 sm:$0xff]   ;;  %v4885_v21 = vld [vmem:[%s6671_s7 + $0x120] ss:$20 sps:$4 sm:$0xff]  }
 0x1c8   :  { %867 = vmatprep.subr.bf16.mxu0 %v4814_v23  ;;  %4634 = vmatprep.subr.bf16.mxu1 %v5452_v1  ;;  %v420_v23 = vld [vmem:[#allocation11] sm:$0x7] }
 0x1c9   :  { %897 = vmatprep.mubr.bf16.mxu0 %v5449_v0  ;;  %4648 = vmatprep.mubr.msk.bf16.mxu1 %vm5453_vm0, %v5452_v1 }
 0x1cb   :  { %868 = vmatpush1.bf16.msra.mxu0 %v4812_v24  ;;  %4635 = vmatpush3.bf16.msra.mxu1 %v4815_v25  ;;  %v436_v25 = vrot.slane %v420_v23, %v5876_v27 }
 0x1cc   :  { %869 = vmatprep.subr.bf16.mxu0 %v4818_v26  ;;  %4636 = vmatprep.subr.bf16.mxu1 %v5452_v1 }
 0x1cf   :  { %870 = vmatpush1.bf16.msra.mxu0 %v4816_v28  ;;  %4637 = vmatpush3.bf16.msra.mxu1 %v4819_v29 }
 0x1d0   :  { %871 = vmatprep.subr.bf16.mxu0 %v4822_v30  ;;  %4638 = vmatprep.subr.bf16.mxu1 %v5452_v1 }
 0x1d3   :  { %872 = vmatpush1.bf16.msra.mxu0 %v4820_v32  ;;  %4639 = vmatpush3.bf16.msra.mxu1 %v4823_v33  ;;  %v428_v32 = vrot.slane %v420_v23, %v5849_v2 }
 0x1d4   :  { %873 = vmatprep.subr.bf16.mxu0 %v4826_v34  ;;  %4640 = vmatprep.subr.bf16.mxu1 %v5452_v1 }
 0x1d7   :  { %874 = vmatpush1.bf16.msra.mxu0 %v4824_v36  ;;  %4641 = vmatpush3.bf16.msra.mxu1 %v4827_v37 }
 0x1d8   :  { %875 = vmatprep.subr.bf16.mxu0 %v4830_v38  ;;  %4642 = vmatprep.subr.bf16.mxu1 %v5452_v1 }
 0x1db   :  { %876 = vmatpush1.bf16.msra.mxu0 %v4828_v39  ;;  %4643 = vmatpush3.bf16.msra.mxu1 %v4831_v40 }
 0x1dc   :  { %877 = vmatprep.subr.bf16.mxu0 %v4834_v41  ;;  %4644 = vmatprep.subr.bf16.mxu1 %v5452_v1 }
 0x1df   :  { %878 = vmatpush1.bf16.msra.mxu0 %v4832_v42  ;;  %4645 = vmatpush3.bf16.msra.mxu1 %v4835_v43 }
 0x1e0   :  { %879 = vmatprep.subr.bf16.mxu0 %v4838_v44  ;;  %4646 = vmatprep.subr.bf16.mxu1 %v5452_v1  ;;  %v4888_v44 = vld [vmem:[#allocation14] ss:$36 sps:$4 sm:$0xff]  }
 0x1e3   :  { %880 = vmatpush1.bf16.msra.mxu0 %v4836_v46  ;;  %4647 = vmatpush3.bf16.msra.mxu1 %v4839_v47  ;;  %v4894_v47 = vld [vmem:[#allocation14 + $0x4c] ss:$36 sps:$4 sm:$0xff]  }
 0x1e4   :  { %1343 = vmatprep.subr.bf16.mxu1 %v4842_v50  ;;  %1384 = vmatprep.subr.bf16.mxu0 %v4845_v52  ;;  %v4898_v50 = vld [vmem:[#allocation14 + $0x94] ss:$36 sps:$4 sm:$0xff]   ;;  %v4899_v52 = vld [vmem:[%s6671_s7 + $0x60] ss:$20 sps:$4 sm:$0xff]  }
 0x1e6   :  { %898 = vmatmul.mubr.bf16.vlgmr.msra.gmra.mrb[4].mxu0 %v423_v48  ;;  %4649 = vmatmul.mubr.bf16.vlgmr.msra.gmra.mrb[8].mxu1 %v423_v48  ;;  %v4892_v48 = vld [vmem:[#allocation14 + $0x48] ss:$36 sps:$4 sm:$0xff]  }
 0x1e7   :  { %1375 = vmatprep.mubr.bf16.mxu1 %v5449_v0  ;;  %1416 = vmatprep.mubr.bf16.mxu0 %v5449_v0 }
 0x1e8   :  { %1344 = vmatpush1.bf16.msra.mxu1 %v4840_v49  ;;  %1385 = vmatpush1.bf16.msra.mxu0 %v4843_v51  ;;  %v4895_v49 = vld [vmem:[%s6671_s7 + $0x38] ss:$20 sps:$4 sm:$0xff]  }
 0x1e9   :  { %1345 = vmatprep.subr.bf16.mxu1 %v4848_v53  ;;  %1386 = vmatprep.subr.bf16.mxu0 %v4851_v54  ;;  %v4896_v51 = vld [vmem:[#allocation14 + $0x90] ss:$36 sps:$4 sm:$0xff]   ;;  %v4902_v53 = vld [vmem:[#allocation14 + $0xdc] ss:$36 sps:$4 sm:$0xff]   ;;  %v432_v54 = vrot.slane %v420_v23, %v5852_v4 }
 0x1ea   :  { %v4932_v23 = vld [vmem:[#allocation14 + $0x98] ss:$36 sps:$4 sm:$0xff]  }
 0x1ec   :  { %1346 = vmatpush1.bf16.msra.mxu1 %v4846_v55  ;;  %1387 = vmatpush1.bf16.msra.mxu0 %v4849_v56  ;;  %v4900_v55 = vld [vmem:[#allocation14 + $0xd8] ss:$36 sps:$4 sm:$0xff]   ;;  %v4903_v56 = vld [vmem:[%s6671_s7 + $0x88] ss:$20 sps:$4 sm:$0xff]  }
 0x1ed   :  { %1347 = vmatprep.subr.bf16.mxu1 %v4854_v57  ;;  %1388 = vmatprep.subr.bf16.mxu0 %v4857_v58  ;;  %v4906_v57 = vld [vmem:[#allocation14 + $0x124] ss:$36 sps:$4 sm:$0xff]  }
 0x1f0   :  { %1348 = vmatpush1.bf16.msra.mxu1 %v4852_v59  ;;  %1389 = vmatpush1.bf16.msra.mxu0 %v4855_v60  ;;  %v4904_v59 = vld [vmem:[#allocation14 + $0x120] ss:$36 sps:$4 sm:$0xff]   ;;  %v4907_v60 = vld [vmem:[%s6671_s7 + $0xb0] ss:$20 sps:$4 sm:$0xff]  }
 0x1f1   :  { %1349 = vmatprep.subr.bf16.mxu1 %v4860_v61  ;;  %1390 = vmatprep.subr.bf16.mxu0 %v4863_v62  ;;  %v4910_v61 = vld [vmem:[#allocation14 + $0x16c] ss:$36 sps:$4 sm:$0xff]  }
 0x1f2   :  { %v4908_v62 = vld [vmem:[#allocation14 + $0x168] ss:$36 sps:$4 sm:$0xff]  }
 0x1f4   :  { %1350 = vmatpush1.bf16.msra.mxu1 %v4858_v3  ;;  %1391 = vmatpush1.bf16.msra.mxu0 %v4861_v5  ;;  %v4911_v3 = vld [vmem:[%s6671_s7 + $0xd8] ss:$20 sps:$4 sm:$0xff]  }
 0x1f5   :  { %1351 = vmatprep.subr.bf16.mxu1 %v4866_v6  ;;  %1392 = vmatprep.subr.bf16.mxu0 %v4869_v7  ;;  %v4914_v5 = vld [vmem:[#allocation14 + $0x1b4] ss:$36 sps:$4 sm:$0xff]   ;;  %v4915_v7 = vld [vmem:[%s6671_s7 + $0x100] ss:$20 sps:$4 sm:$0xff]  }
 0x1f6   :  { %v4912_v6 = vld [vmem:[#allocation14 + $0x1b0] ss:$36 sps:$4 sm:$0xff]  }
 0x1f8   :  { %1352 = vmatpush1.bf16.msra.mxu1 %v4864_v8  ;;  %1393 = vmatpush1.bf16.msra.mxu0 %v4867_v9  ;;  %v4918_v8 = vld [vmem:[#allocation14 + $0x1fc] ss:$36 sps:$4 sm:$0xff]  }
 0x1f9   :  { %1353 = vmatprep.subr.bf16.mxu1 %v4872_v10  ;;  %1394 = vmatprep.subr.bf16.mxu0 %v4875_v11  ;;  %v4916_v9 = vld [vmem:[#allocation14 + $0x1f8] ss:$36 sps:$4 sm:$0xff]   ;;  %v4919_v10 = vld [vmem:[%s6671_s7 + $0x128] ss:$20 sps:$4 sm:$0xff]  }
 0x1fa   :  { %v4922_v11 = vld [vmem:[#allocation14 + $0xc] ss:$36 sps:$4 sm:$0xff]  }
 0x1fc   :  { %1354 = vmatpush1.bf16.msra.mxu1 %v4870_v12  ;;  %1395 = vmatpush1.bf16.msra.mxu0 %v4873_v13  ;;  %v4925_v12 = vld [vmem:[#allocation14 + $0x14] ss:$36 sps:$4 sm:$0xff]  }
 0x1fd   :  { %1355 = vmatprep.subr.bf16.mxu1 %v4878_v14  ;;  %1396 = vmatprep.subr.bf16.mxu0 %v4881_v15  ;;  %v4920_v14 = vld [vmem:[#allocation14 + $0x8] ss:$36 sps:$4 sm:$0xff]   ;;  %v4923_v15 = vld [vmem:[#allocation14 + $0x10] ss:$36 sps:$4 sm:$0xff]  }
 0x200   :  { %1356 = vmatpush1.bf16.msra.mxu1 %v4876_v16  ;;  %1397 = vmatpush1.bf16.msra.mxu0 %v4879_v17  ;;  %v4928_v17 = vld [vmem:[#allocation14 + $0x54] ss:$36 sps:$4 sm:$0xff]  }
 0x201   :  { %1357 = vmatprep.subr.bf16.mxu1 %v4884_v18  ;;  %1398 = vmatprep.subr.bf16.mxu0 %v4887_v19  ;;  %v4931_v18 = vld [vmem:[#allocation14 + $0x5c] ss:$36 sps:$4 sm:$0xff]   ;;  %v4926_v19 = vld [vmem:[#allocation14 + $0x50] ss:$36 sps:$4 sm:$0xff]  }
 0x204   :  { %1358 = vmatpush1.bf16.msra.mxu1 %v4882_v20  ;;  %1399 = vmatpush1.bf16.msra.mxu0 %v4885_v21  ;;  %v4929_v20 = vld [vmem:[#allocation14 + $0x58] ss:$36 sps:$4 sm:$0xff]  }
 0x205   :  { %4652 = vmatprep.subr.bf16.mxu1 %v5452_v1  ;;  %2106 = vmatprep.subr.bf16.mxu0 %v4890_v22  ;;  %v4934_v21 = vld [vmem:[#allocation14 + $0x9c] ss:$36 sps:$4 sm:$0xff]   ;;  %v4937_v22 = vld [vmem:[#allocation14 + $0xa4] ss:$36 sps:$4 sm:$0xff]  }
 0x299   :  { %v4430_v24 = vpop.f32.mrb[4].mxu1 }
 0x29a   :  { %v4431_v26 = vpop.f32.mrb[5].mxu1 }
 0x29b   :  { %v4432_v28 = vadd.f32 %v4431_v26, %v4430_v24  ;;  %v4433_v29 = vpop.f32.mrb[6].mxu1  ;;  %v4935_v24 = vld [vmem:[#allocation14 + $0xa0] ss:$36 sps:$4 sm:$0xff]   ;;  %v4943_v26 = vld [vmem:[#allocation14 + $0xec] ss:$36 sps:$4 sm:$0xff]  }
 0x29c   :  { %v4434_v30 = vpop.f32.mrb[7].mxu1  ;;  %v4941_v29 = vld [vmem:[#allocation14 + $0xe8] ss:$36 sps:$4 sm:$0xff]  }
 0x29d   :  { %v941_v31 = vadd.f32 %v4432_v28, %v436_v25  ;;  %v4940_v25 = vld [vmem:[#allocation14 + $0xe4] ss:$36 sps:$4 sm:$0xff]   ;;  %v4946_v30 = vld [vmem:[#allocation14 + $0x12c] ss:$36 sps:$4 sm:$0xff]  }
 0x29e   :  { %v4938_v28 = vld [vmem:[#allocation14 + $0xe0] ss:$36 sps:$4 sm:$0xff]  }
 0x2b9   :  { %v899_v33 = vpop.f32.mrb[4].mxu0  ;;  %v980_v34 = vpop.f32.mrb[8].mxu1 }
 0x2ba   :  { %v4712_v35 = vadd.f32 %v899_v33, %v428_v32  ;;  %v6040_v36 = vadd.f32 %v980_v34, %v941_v31  ;;  %v901_v37 = vpop.f32.mrb[5].mxu0  ;;  %v4650_v38 = vpop.f32.mrb[9].mxu1  ;;  %v4949_v31 = vld [vmem:[#allocation14 + $0x134] ss:$36 sps:$4 sm:$0xff]   ;;  %v4944_v32 = vld [vmem:[#allocation14 + $0x128] ss:$36 sps:$4 sm:$0xff]  }
 0x2bb   :  { %v903_v39 = vpop.f32.mrb[6].mxu0  ;;  %v983_v40 = vpop.f32.mrb[10].mxu1  ;;  %v4713_v58 = vadd.f32 %v901_v37, %v432_v54  ;;  %v4947_v33 = vld [vmem:[#allocation14 + $0x130] ss:$36 sps:$4 sm:$0xff]   ;;  %v4953_v38 = vld [vmem:[#allocation14 + $0x178] ss:$36 sps:$4 sm:$0xff]  }
 0x2bc   :  { %5162 = vtanh.f32 %v4712_v35  ;;  %v904_v41 = vpop.f32.mrb[7].mxu0  ;;  %v4651_v42 = vpop.f32.mrb[11].mxu1  ;;  %v4952_v34 = vld [vmem:[#allocation14 + $0x174] ss:$36 sps:$4 sm:$0xff]   ;;  %v4955_v35 = vld [vmem:[#allocation14 + $0x17c] ss:$36 sps:$4 sm:$0xff]  }
 0x2bd   :  { %5164 = vtanh.f32 %v4713_v58  ;;  %v4950_v37 = vld [vmem:[#allocation14 + $0x170] ss:$36 sps:$4 sm:$0xff]   ;;  %v4958_v39 = vld [vmem:[#allocation14 + $0x1bc] ss:$36 sps:$4 sm:$0xff]   ;;  %v4961_v40 = vld [vmem:[#allocation14 + $0x1c4] ss:$36 sps:$4 sm:$0xff]  }
 0x2be   :  { %v4956_v41 = vld [vmem:[#allocation14 + $0x1b8] ss:$36 sps:$4 sm:$0xff]   ;;  %v4959_v42 = vld [vmem:[#allocation14 + $0x1c0] ss:$36 sps:$4 sm:$0xff]   ;;  %v4976_v54 = vld [vmem:[#allocation14 + $0xa8] ss:$36 sps:$4 sm:$0xff]   ;;  %5166 = vtanh.f32 %v6040_v36 }
 0x2bf   :  { %v4983_v58 = vld [vmem:[#allocation14 + $0xf8] ss:$36 sps:$4 sm:$0xff]  }
 0x2c0   :  { %v5024_v36 = vld [vmem:[%s6679_s15 + $0x90] ss:$12 sps:$4 sm:$0xff]  }
 0x2c6   :  { %v5163_v43 = vpop.eup %5162 }
 0x2c7   :  { %v6045_v46 = vpack.c.bf16 %v5163_v43, %v5163_v43  ;;  %v5165_v13 = vpop.eup %5164  ;;  %v4964_v43 = vld [vmem:[#allocation14 + $0x204] ss:$36 sps:$4 sm:$0xff]  }
 0x2c8   :  { %v6081_v16 = vpack.c.bf16 %v5165_v13, %v5165_v13  ;;  %v5000_v13 = vld [vmem:[%s6679_s15] ss:$12 sps:$4 sm:$0xff]  }
 0x2c9   :  { %1376 = vmatmul.mubr.bf16.vlgmr.msra.gmra.mrb[12].mxu1 %v6045_v46  ;;  %1417 = vmatmul.mubr.bf16.vlgmr.msra.gmra.mrb[8].mxu0 %v6045_v46 }
 0x2ca   :  { %4653 = vmatpush3.bf16.msra.mxu1 %v4891_v45  ;;  %2107 = vmatpush1.bf16.msra.mxu0 %v4888_v44  ;;  %v4967_v44 = vld [vmem:[#allocation14 + $0x20c] ss:$36 sps:$4 sm:$0xff]   ;;  %v4962_v45 = vld [vmem:[#allocation14 + $0x200] ss:$36 sps:$4 sm:$0xff]  }
 0x2cb   :  { %4654 = vmatprep.subr.bf16.mxu1 %v5452_v1  ;;  %2108 = vmatprep.subr.bf16.mxu0 %v4894_v47  ;;  %v4970_v47 = vld [vmem:[#allocation14 + $0x1c] ss:$36 sps:$4 sm:$0xff]  }
 0x2cc   :  { %4668 = vmatprep.mubr.msk.bf16.mxu1 %vm5453_vm0, %v5452_v1  ;;  %2138 = vmatprep.mubr.bf16.mxu0 %v5449_v0 }
 0x2ce   :  { %4655 = vmatpush3.bf16.msra.mxu1 %v4895_v49  ;;  %2109 = vmatpush1.bf16.msra.mxu0 %v4892_v48  ;;  %v4968_v48 = vld [vmem:[#allocation14 + $0x18] ss:$36 sps:$4 sm:$0xff]   ;;  %v4971_v49 = vld [vmem:[#allocation14 + $0x20] ss:$36 sps:$4 sm:$0xff]  }
 0x2cf   :  { %4656 = vmatprep.subr.bf16.mxu1 %v5452_v1  ;;  %2110 = vmatprep.subr.bf16.mxu0 %v4898_v50  ;;  %v4974_v50 = vld [vmem:[#allocation14 + $0x64] ss:$36 sps:$4 sm:$0xff]  }
 0x2d2   :  { %4657 = vmatpush3.bf16.msra.mxu1 %v4899_v52  ;;  %2111 = vmatpush1.bf16.msra.mxu0 %v4896_v51  ;;  %v4972_v51 = vld [vmem:[#allocation14 + $0x60] ss:$36 sps:$4 sm:$0xff]   ;;  %v4975_v52 = vld [vmem:[#allocation14 + $0x68] ss:$36 sps:$4 sm:$0xff]  }
 0x2d3   :  { %4658 = vmatprep.subr.bf16.mxu1 %v5452_v1  ;;  %2112 = vmatprep.subr.bf16.mxu0 %v4902_v53  ;;  %v4978_v53 = vld [vmem:[#allocation14 + $0xac] ss:$36 sps:$4 sm:$0xff]  }
 0x2d6   :  { %4659 = vmatpush3.bf16.msra.mxu1 %v4903_v56  ;;  %2113 = vmatpush1.bf16.msra.mxu0 %v4900_v55  ;;  %v4979_v55 = vld [vmem:[#allocation14 + $0xb0] ss:$36 sps:$4 sm:$0xff]  }
 0x2d7   :  { %4660 = vmatprep.subr.bf16.mxu1 %v5452_v1  ;;  %2114 = vmatprep.subr.bf16.mxu0 %v4906_v57  ;;  %v4982_v56 = vld [vmem:[#allocation14 + $0xf4] ss:$36 sps:$4 sm:$0xff]  }
 0x2d8   :  { %v4980_v57 = vld [vmem:[#allocation14 + $0xf0] ss:$36 sps:$4 sm:$0xff]  }
 0x2da   :  { %4661 = vmatpush3.bf16.msra.mxu1 %v4907_v60  ;;  %2115 = vmatpush1.bf16.msra.mxu0 %v4904_v59  ;;  %v4986_v59 = vld [vmem:[#allocation14 + $0x13c] ss:$36 sps:$4 sm:$0xff]  }
 0x2db   :  { %4662 = vmatprep.subr.bf16.mxu1 %v5452_v1  ;;  %2116 = vmatprep.subr.bf16.mxu0 %v4910_v61  ;;  %v4984_v60 = vld [vmem:[#allocation14 + $0x138] ss:$36 sps:$4 sm:$0xff]   ;;  %v4987_v61 = vld [vmem:[#allocation14 + $0x140] ss:$36 sps:$4 sm:$0xff]  }
 0x2de   :  { %4663 = vmatpush3.bf16.msra.mxu1 %v4911_v3  ;;  %2117 = vmatpush1.bf16.msra.mxu0 %v4908_v62  ;;  %v4990_v62 = vld [vmem:[#allocation14 + $0x184] ss:$36 sps:$4 sm:$0xff]  }
 0x2df   :  { %4664 = vmatprep.subr.bf16.mxu1 %v5452_v1  ;;  %2118 = vmatprep.subr.bf16.mxu0 %v4914_v5  ;;  %v4988_v3 = vld [vmem:[#allocation14 + $0x180] ss:$36 sps:$4 sm:$0xff]   ;;  %v4991_v5 = vld [vmem:[#allocation14 + $0x188] ss:$36 sps:$4 sm:$0xff]  }
 0x2e2   :  { %4665 = vmatpush3.bf16.msra.mxu1 %v4915_v7  ;;  %2119 = vmatpush1.bf16.msra.mxu0 %v4912_v6  ;;  %v4994_v6 = vld [vmem:[#allocation14 + $0x1cc] ss:$36 sps:$4 sm:$0xff]  }
 0x2e3   :  { %4666 = vmatprep.subr.bf16.mxu1 %v5452_v1  ;;  %2120 = vmatprep.subr.bf16.mxu0 %v4918_v8  ;;  %v4992_v7 = vld [vmem:[#allocation14 + $0x1c8] ss:$36 sps:$4 sm:$0xff]   ;;  %v4995_v8 = vld [vmem:[#allocation14 + $0x1d0] ss:$36 sps:$4 sm:$0xff]  }
 0x2e6   :  { %4667 = vmatpush3.bf16.msra.mxu1 %v4919_v10  ;;  %2121 = vmatpush1.bf16.msra.mxu0 %v4916_v9  ;;  %v4998_v9 = vld [vmem:[#allocation14 + $0x214] ss:$36 sps:$4 sm:$0xff]  }
 0x2e7   :  { %2147 = vmatprep.subr.bf16.mxu1 %v4922_v11  ;;  %2188 = vmatprep.subr.bf16.mxu0 %v4925_v12  ;;  %v4996_v10 = vld [vmem:[#allocation14 + $0x210] ss:$36 sps:$4 sm:$0xff]   ;;  %v4999_v11 = vld [vmem:[#allocation14 + $0x218] ss:$36 sps:$4 sm:$0xff]  }
 0x2e8   :  { %v5002_v12 = vld [vmem:[%s6679_s15 + $0x4] ss:$12 sps:$4 sm:$0xff]  }
 0x2e9   :  { %4669 = vmatmul.mubr.bf16.vlgmr.msra.gmra.mrb[16].mxu1 %v6045_v46  ;;  %2139 = vmatmul.mubr.bf16.vlgmr.msra.gmra.mrb[12].mxu0 %v6081_v16  ;;  %v4965_v46 = vld [vmem:[#allocation14 + $0x208] ss:$36 sps:$4 sm:$0xff]  }
 0x2ea   :  { %2148 = vmatpush1.bf16.msra.mxu1 %v4920_v14  ;;  %2189 = vmatpush1.bf16.msra.mxu0 %v4923_v15  ;;  %v5003_v14 = vld [vmem:[%s6679_s15 + $0x8] ss:$12 sps:$4 sm:$0xff]  }
 0x2eb   :  { %2149 = vmatprep.subr.bf16.mxu1 %v4928_v17  ;;  %2190 = vmatprep.subr.bf16.mxu0 %v4931_v18  ;;  %v5006_v15 = vld [vmem:[%s6679_s15 + $0x1c] ss:$12 sps:$4 sm:$0xff]   ;;  %v5004_v17 = vld [vmem:[%s6679_s15 + $0x18] ss:$12 sps:$4 sm:$0xff]   ;;  %v5007_v18 = vld [vmem:[%s6679_s15 + $0x20] ss:$12 sps:$4 sm:$0xff]  }
 0x2ec   :  { %2179 = vmatprep.mubr.bf16.mxu1 %v5449_v0  ;;  %2220 = vmatprep.mubr.bf16.mxu0 %v5449_v0 }
 0x2ee   :  { %2150 = vmatpush1.bf16.msra.mxu1 %v4926_v19  ;;  %2191 = vmatpush1.bf16.msra.mxu0 %v4929_v20  ;;  %v5010_v19 = vld [vmem:[%s6679_s15 + $0x34] ss:$12 sps:$4 sm:$0xff]   ;;  %v5011_v20 = vld [vmem:[%s6679_s15 + $0x38] ss:$12 sps:$4 sm:$0xff]  }
 0x2ef   :  { %2151 = vmatprep.subr.bf16.mxu1 %v4934_v21  ;;  %2192 = vmatprep.subr.bf16.mxu0 %v4937_v22  ;;  %v5014_v21 = vld [vmem:[%s6679_s15 + $0x4c] ss:$12 sps:$4 sm:$0xff]   ;;  %v5012_v22 = vld [vmem:[%s6679_s15 + $0x48] ss:$12 sps:$4 sm:$0xff]  }
 0x2f2   :  { %2152 = vmatpush1.bf16.msra.mxu1 %v4932_v23  ;;  %2193 = vmatpush1.bf16.msra.mxu0 %v4935_v24  ;;  %v5015_v23 = vld [vmem:[%s6679_s15 + $0x50] ss:$12 sps:$4 sm:$0xff]  }
 0x2f3   :  { %2153 = vmatprep.subr.bf16.mxu1 %v4940_v25  ;;  %2194 = vmatprep.subr.bf16.mxu0 %v4943_v26  ;;  %v5018_v24 = vld [vmem:[%s6679_s15 + $0x64] ss:$12 sps:$4 sm:$0xff]   ;;  %v5016_v25 = vld [vmem:[%s6679_s15 + $0x60] ss:$12 sps:$4 sm:$0xff]   ;;  %v5019_v26 = vld [vmem:[%s6679_s15 + $0x68] ss:$12 sps:$4 sm:$0xff]  }
 0x2f6   :  { %2154 = vmatpush1.bf16.msra.mxu1 %v4938_v28  ;;  %2195 = vmatpush1.bf16.msra.mxu0 %v4941_v29  ;;  %v5022_v28 = vld [vmem:[%s6679_s15 + $0x7c] ss:$12 sps:$4 sm:$0xff]   ;;  %v5020_v29 = vld [vmem:[%s6679_s15 + $0x78] ss:$12 sps:$4 sm:$0xff]  }
 0x2f7   :  { %2155 = vmatprep.subr.bf16.mxu1 %v4946_v30  ;;  %2196 = vmatprep.subr.bf16.mxu0 %v4949_v31  ;;  %v5023_v30 = vld [vmem:[%s6679_s15 + $0x80] ss:$12 sps:$4 sm:$0xff]  }
 0x2f8   :  { %v5026_v31 = vld [vmem:[%s6679_s15 + $0x94] ss:$12 sps:$4 sm:$0xff]  }
 0x2fa   :  { %2156 = vmatpush1.bf16.msra.mxu1 %v4944_v32  ;;  %2197 = vmatpush1.bf16.msra.mxu0 %v4947_v33  ;;  %v5027_v32 = vld [vmem:[%s6679_s15 + $0x98] ss:$12 sps:$4 sm:$0xff]  }
 0x2fb   :  { %2157 = vmatprep.subr.bf16.mxu1 %v4952_v34  ;;  %2198 = vmatprep.subr.bf16.mxu0 %v4955_v35  ;;  %v5030_v33 = vld [vmem:[%s6679_s15 + $0xac] ss:$12 sps:$4 sm:$0xff]   ;;  %v5028_v34 = vld [vmem:[%s6679_s15 + $0xa8] ss:$12 sps:$4 sm:$0xff]   ;;  %v5031_v35 = vld [vmem:[%s6679_s15 + $0xb0] ss:$12 sps:$4 sm:$0xff]  }
 0x2fe   :  { %2158 = vmatpush1.bf16.msra.mxu1 %v4950_v37  ;;  %2199 = vmatpush1.bf16.msra.mxu0 %v4953_v38  ;;  %v5034_v37 = vld [vmem:[%s6673_s9 + $0x4] ss:$16 sps:$4 sm:$0xff]   ;;  %v5037_v38 = vld [vmem:[%s6673_s9 + $0xc] ss:$16 sps:$4 sm:$0xff]  }
 0x2ff   :  { %2159 = vmatprep.subr.bf16.mxu1 %v4958_v39  ;;  %2200 = vmatprep.subr.bf16.mxu0 %v4961_v40  ;;  %v5167_v39 = vpop.eup %5166  ;;  %v5032_v40 = vld [vmem:[%s6673_s9] ss:$16 sps:$4 sm:$0xff]  }
 0x302   :  { %2160 = vmatpush1.bf16.msra.mxu1 %v4956_v41  ;;  %2201 = vmatpush1.bf16.msra.mxu0 %v4959_v42  ;;  %v5035_v41 = vld [vmem:[%s6673_s9 + $0x8] ss:$16 sps:$4 sm:$0xff]  }
 0x303   :  { %2161 = vmatprep.subr.bf16.mxu1 %v4964_v43  ;;  %2202 = vmatprep.subr.bf16.mxu0 %v4967_v44  ;;  %v5176_v42 = vld [vmem:[#allocation6] sm:$0xff]  ;;  %v5038_v44 = vld [vmem:[%s6674_s10 + $0x40] sm:$0xff]  }
 0x304   :  { %v2604_v43 = vpack.c.bf16 %v5176_v42, %v5176_v42 }
 0x306   :  { %2162 = vmatpush1.bf16.msra.mxu1 %v4962_v45  ;;  %2203 = vmatpush1.bf16.msra.mxu0 %v4965_v46  ;;  %v5039_v45 = vld [vmem:[%s6674_s10 + $0xc0] sm:$0xff]  }
 0x307   :  { %2229 = vmatprep.subr.bf16.mxu1 %v4970_v47  ;;  %4672 = vmatprep.subr.bf16.mxu0 %v5452_v1  ;;  %v5040_v46 = vld [vmem:[%s6674_s10] sm:$0xff]  }
 0x308   :  { %v5041_v47 = vld [vmem:[%s6674_s10 + $0x80] sm:$0xff]  }
 0x309   :  { %2180 = vmatmul.mubr.bf16.vlgmr.msra.gmra.mrb[20].mxu1 %v6081_v16  ;;  %2221 = vmatmul.mubr.bf16.vlgmr.msra.gmra.mrb[16].mxu0 %v6081_v16 }
 0x30a   :  { %2230 = vmatpush1.bf16.msra.mxu1 %v4968_v48  ;;  %4673 = vmatpush3.bf16.msra.mxu0 %v4971_v49  ;;  %v5042_v48 = vld [vmem:[%s6674_s10 + $0x48] sm:$0xff]  }
 0x30b   :  { %2231 = vmatprep.subr.bf16.mxu1 %v4974_v50  ;;  %4674 = vmatprep.subr.bf16.mxu0 %v5452_v1  ;;  %v5043_v49 = vld [vmem:[%s6674_s10 + $0xc8] sm:$0xff]  }
 0x30c   :  { %2261 = vmatprep.mubr.bf16.mxu1 %v5449_v0  ;;  %4688 = vmatprep.mubr.msk.bf16.mxu0 %vm5453_vm0, %v5452_v1  ;;  %v5044_v50 = vld [vmem:[%s6674_s10 + $0x8] sm:$0xff]  }
 0x30e   :  { %2232 = vmatpush1.bf16.msra.mxu1 %v4972_v51  ;;  %4675 = vmatpush3.bf16.msra.mxu0 %v4975_v52  ;;  %v5045_v51 = vld [vmem:[%s6674_s10 + $0x88] sm:$0xff]   ;;  %v5046_v52 = vld [vmem:[%s6674_s10 + $0x50] sm:$0xff]  }
 0x30f   :  { %2233 = vmatprep.subr.bf16.mxu1 %v4978_v53  ;;  %4676 = vmatprep.subr.bf16.mxu0 %v5452_v1  ;;  %v5047_v53 = vld [vmem:[%s6674_s10 + $0xd0] sm:$0xff]  }
 0x312   :  { %2234 = vmatpush1.bf16.msra.mxu1 %v4976_v54  ;;  %4677 = vmatpush3.bf16.msra.mxu0 %v4979_v55  ;;  %v5048_v54 = vld [vmem:[%s6674_s10 + $0x10] sm:$0xff]  }
 0x313   :  { %2235 = vmatprep.subr.bf16.mxu1 %v4982_v56  ;;  %4678 = vmatprep.subr.bf16.mxu0 %v5452_v1  ;;  %v5049_v55 = vld [vmem:[%s6674_s10 + $0x90] sm:$0xff]   ;;  %v5050_v56 = vld [vmem:[%s6674_s10 + $0x58] sm:$0xff]  }
 0x316   :  { %2236 = vmatpush1.bf16.msra.mxu1 %v4980_v57  ;;  %4679 = vmatpush3.bf16.msra.mxu0 %v4983_v58  ;;  %v5051_v57 = vld [vmem:[%s6674_s10 + $0xd8] sm:$0xff]  }
 0x317   :  { %2237 = vmatprep.subr.bf16.mxu1 %v4986_v59  ;;  %4680 = vmatprep.subr.bf16.mxu0 %v5452_v1  ;;  %v5052_v58 = vld [vmem:[%s6674_s10 + $0x18] sm:$0xff]  }
 0x318   :  { %v5053_v59 = vld [vmem:[%s6674_s10 + $0x98] sm:$0xff]  }
 0x31a   :  { %2238 = vmatpush1.bf16.msra.mxu1 %v4984_v60  ;;  %4681 = vmatpush3.bf16.msra.mxu0 %v4987_v61  ;;  %v5054_v60 = vld [vmem:[%s6674_s10 + $0x60] sm:$0xff]  }
 0x31b   :  { %2239 = vmatprep.subr.bf16.mxu1 %v4990_v62  ;;  %4682 = vmatprep.subr.bf16.mxu0 %v5452_v1  ;;  %v5055_v61 = vld [vmem:[%s6674_s10 + $0xe0] sm:$0xff]  }
 0x31c   :  { %v5056_v62 = vld [vmem:[%s6674_s10 + $0x20] sm:$0xff]  }
 0x31e   :  { %2240 = vmatpush1.bf16.msra.mxu1 %v4988_v3  ;;  %4683 = vmatpush3.bf16.msra.mxu0 %v4991_v5  ;;  %v5057_v3 = vld [vmem:[%s6674_s10 + $0xa0] sm:$0xff]  }
 0x31f   :  { %2241 = vmatprep.subr.bf16.mxu1 %v4994_v6  ;;  %4684 = vmatprep.subr.bf16.mxu0 %v5452_v1 }
 0x322   :  { %2242 = vmatpush1.bf16.msra.mxu1 %v4992_v7  ;;  %4685 = vmatpush3.bf16.msra.mxu0 %v4995_v8 }
 0x323   :  { %2243 = vmatprep.subr.bf16.mxu1 %v4998_v9  ;;  %4686 = vmatprep.subr.bf16.mxu0 %v5452_v1  ;;  %v5058_v9 = vld [vmem:[%s6674_s10 + $0x68] sm:$0xff]  }
 0x326   :  { %2244 = vmatpush1.bf16.msra.mxu1 %v4996_v10  ;;  %4687 = vmatpush3.bf16.msra.mxu0 %v4999_v11  ;;  %v5059_v10 = vld [vmem:[%s6674_s10 + $0xe8] sm:$0xff]  }
 0x327   :  { %2523 = vmatprep.subr.bf16.mxu1 %v5002_v12  ;;  %4692 = vmatprep.subr.bf16.mxu0 %v5452_v1 }
 0x329   :  { %2262 = vmatmul.mubr.bf16.vlgmr.msra.gmra.mrb[24].mxu1 %v6081_v16  ;;  %4689 = vmatmul.mubr.bf16.vlgmr.msra.gmra.mrb[20].mxu0 %v6081_v16  ;;  %v5008_v16 = vld [vmem:[%s6679_s15 + $0x30] ss:$12 sps:$4 sm:$0xff]  }
 0x32a   :  { %2524 = vmatpush1.bf16.msra.mxu1 %v5000_v13  ;;  %4693 = vmatpush3.bf16.msra.mxu0 %v5003_v14  ;;  %v5060_v13 = vld [vmem:[%s6674_s10 + $0x28] sm:$0xff]  }
 0x32b   :  { %2525 = vmatprep.subr.bf16.mxu1 %v5006_v15  ;;  %4694 = vmatprep.subr.bf16.mxu0 %v5452_v1  ;;  %v5061_v14 = vld [vmem:[%s6674_s10 + $0xa8] sm:$0xff]  }
 0x32c   :  { %2555 = vmatprep.mubr.bf16.mxu1 %v5449_v0  ;;  %4708 = vmatprep.mubr.msk.bf16.mxu0 %vm5453_vm0, %v5452_v1 }
 0x32e   :  { %2526 = vmatpush1.bf16.msra.mxu1 %v5004_v17  ;;  %4695 = vmatpush3.bf16.msra.mxu0 %v5007_v18  ;;  %v5062_v18 = vld [vmem:[%s6674_s10 + $0x70] sm:$0xff]  }
 0x32f   :  { %2527 = vmatprep.subr.bf16.mxu1 %v5010_v19  ;;  %4696 = vmatprep.subr.bf16.mxu0 %v5452_v1  ;;  %v5063_v19 = vld [vmem:[%s6674_s10 + $0xf0] sm:$0xff]  }
 0x332   :  { %2528 = vmatpush1.bf16.msra.mxu1 %v5008_v16  ;;  %4697 = vmatpush3.bf16.msra.mxu0 %v5011_v20  ;;  %v5064_v16 = vld [vmem:[%s6674_s10 + $0x30] sm:$0xff]  }
 0x333   :  { %2529 = vmatprep.subr.bf16.mxu1 %v5014_v21  ;;  %4698 = vmatprep.subr.bf16.mxu0 %v5452_v1  ;;  %v5065_v20 = vld [vmem:[%s6674_s10 + $0xb0] sm:$0xff]   ;;  %v5066_v21 = vld [vmem:[%s6674_s10 + $0x78] sm:$0xff]  }
 0x336   :  { %2530 = vmatpush1.bf16.msra.mxu1 %v5012_v22  ;;  %4699 = vmatpush3.bf16.msra.mxu0 %v5015_v23  ;;  %v5067_v22 = vld [vmem:[%s6674_s10 + $0xf8] sm:$0xff]  }
 0x337   :  { %2531 = vmatprep.subr.bf16.mxu1 %v5018_v24  ;;  %4700 = vmatprep.subr.bf16.mxu0 %v5452_v1  ;;  %v5068_v23 = vld [vmem:[%s6674_s10 + $0x38] sm:$0xff]  }
 0x338   :  { %v5069_v24 = vld [vmem:[%s6674_s10 + $0xb8] sm:$0xff]  }
 0x33a   :  { %2532 = vmatpush1.bf16.msra.mxu1 %v5016_v25  ;;  %4701 = vmatpush3.bf16.msra.mxu0 %v5019_v26 }
 0x33b   :  { %2533 = vmatprep.subr.bf16.mxu1 %v5022_v28  ;;  %4702 = vmatprep.subr.bf16.mxu0 %v5452_v1 }
 0x33e   :  { %2534 = vmatpush1.bf16.msra.mxu1 %v5020_v29  ;;  %4703 = vmatpush3.bf16.msra.mxu0 %v5023_v30 }
 0x33f   :  { %2535 = vmatprep.subr.bf16.mxu1 %v5026_v31  ;;  %4704 = vmatprep.subr.bf16.mxu0 %v5452_v1 }
 0x342   :  { %2536 = vmatpush1.bf16.msra.mxu1 %v5024_v36  ;;  %4705 = vmatpush3.bf16.msra.mxu0 %v5027_v32 }
 0x343   :  { %2537 = vmatprep.subr.bf16.mxu1 %v5030_v33  ;;  %4706 = vmatprep.subr.bf16.mxu0 %v5452_v1  ;;  %v991_v1 = vpack.c.bf16 %v5167_v39, %v5167_v39  ;;  %v1128_v33 = vsub.s32 4, %v5846_v63 }
 0x346   :  { %2538 = vmatpush1.bf16.msra.mxu1 %v5028_v34  ;;  %4707 = vmatpush3.bf16.msra.mxu0 %v5031_v35  ;;  %v1124_v34 = vsub.s32 3, %v5846_v63  ;;  %v6314_v35 = vld [vmem:[#allocation15] sm:$0xff] }
 0x347   :  { %2628 = vmatprep.subr.bf16.mxu0 %v5034_v37  ;;  %2669 = vmatprep.subr.bf16.mxu1 %v5037_v38  ;;  %v1712_v37 = vrot.slane %v6314_v35, %v1128_v33 }
 0x348   :  { %v1708_v38 = vrot.slane %v6314_v35, %v1124_v34 }
 0x349   :  { %2556 = vmatmul.mubr.bf16.vlgmr.msra.gmra.mrb[28].mxu1 %v991_v1  ;;  %4709 = vmatmul.mubr.bf16.vlgmr.msra.gmra.mrb[24].mxu0 %v991_v1 }
 0x34a   :  { %2629 = vmatpush1.bf16.msra.mxu0 %v5032_v40  ;;  %2670 = vmatpush1.bf16.msra.mxu1 %v5035_v41 }
 0x34b   :  { %2660 = vmatprep.mubr.bf16.mxu0 %v5449_v0  ;;  %2701 = vmatprep.mubr.bf16.mxu1 %v5449_v0 }
 0x34c   :  { %4472 = vmatprep.subr.bf16.mxu1 %v5038_v44  ;;  %4494 = vmatprep.subr.bf16.mxu0 %v5039_v45 }
 0x351   :  { %4273 = vmatmul.mubr.msk.bf16.vlgmr.msra.gmra.mrb[28].mxu0 %vm236_vm1, %v2604_v43  ;;  %4274 = vmatmul.mubr.msk.bf16.vlgmr.msra.gmra.mrb[32].mxu1 %vm236_vm1, %v2604_v43 }
 0x352   :  { %4473 = vmatpush3.bf16.msra.mxu1 %v5040_v46  ;;  %4495 = vmatpush3.bf16.msra.mxu0 %v5041_v47 }
 0x353   :  { %4474 = vmatprep.subr.bf16.mxu1 %v5042_v48  ;;  %4496 = vmatprep.subr.bf16.mxu0 %v5043_v49 }
 0x356   :  { %4475 = vmatpush3.bf16.msra.mxu1 %v5044_v50  ;;  %4497 = vmatpush3.bf16.msra.mxu0 %v5045_v51 }
 0x357   :  { %4476 = vmatprep.subr.bf16.mxu1 %v5046_v52  ;;  %4498 = vmatprep.subr.bf16.mxu0 %v5047_v53 }
 0x35a   :  { %4477 = vmatpush3.bf16.msra.mxu1 %v5048_v54  ;;  %4499 = vmatpush3.bf16.msra.mxu0 %v5049_v55 }
 0x35b   :  { %4478 = vmatprep.subr.bf16.mxu1 %v5050_v56  ;;  %4500 = vmatprep.subr.bf16.mxu0 %v5051_v57  ;;  %v6334_v56 = vld [vmem:[#allocation18] sm:$0x7] }
 0x35c   :  { %v2391_v57 = vrot.slane %v6334_v56, %v5876_v27 }
 0x35e   :  { %4479 = vmatpush3.bf16.msra.mxu1 %v5052_v58  ;;  %4501 = vmatpush3.bf16.msra.mxu0 %v5053_v59  ;;  %v1040_v58 = vld [vmem:[#allocation12] sm:$0x1f] }
 0x35f   :  { %4480 = vmatprep.subr.bf16.mxu1 %v5054_v60  ;;  %4502 = vmatprep.subr.bf16.mxu0 %v5055_v61 }
 0x362   :  { %4481 = vmatpush3.bf16.msra.mxu1 %v5056_v62  ;;  %4503 = vmatpush3.bf16.msra.mxu0 %v5057_v3 }
 0x363   :  { %4482 = vmatprep.subr.bf16.mxu1 %v5058_v9  ;;  %4504 = vmatprep.subr.bf16.mxu0 %v5059_v10 }
 0x366   :  { %4483 = vmatpush3.bf16.msra.mxu1 %v5060_v13  ;;  %4505 = vmatpush3.bf16.msra.mxu0 %v5061_v14 }
 0x367   :  { %4484 = vmatprep.subr.bf16.mxu1 %v5062_v18  ;;  %4506 = vmatprep.subr.bf16.mxu0 %v5063_v19 }
 0x36a   :  { %4485 = vmatpush3.bf16.msra.mxu1 %v5064_v16  ;;  %4507 = vmatpush3.bf16.msra.mxu0 %v5065_v20 }
 0x36b   :  { %4486 = vmatprep.subr.bf16.mxu1 %v5066_v21  ;;  %4508 = vmatprep.subr.bf16.mxu0 %v5067_v22 }
 0x36e   :  { %4487 = vmatpush3.bf16.msra.mxu1 %v5068_v23  ;;  %4509 = vmatpush3.bf16.msra.mxu0 %v5069_v24 }
 0x39c   :  { %v6262_v5 = vpop.f32.mrb[12].mxu1  ;;  %v6264_v6 = vpop.f32.mrb[8].mxu0 }
 0x39d   :  { %v6266_v7 = vpop.f32.mrb[13].mxu1  ;;  %v6268_v8 = vpop.f32.mrb[9].mxu0 }
 0x39e   :  { %v1381_v11 = vpop.f32.mrb[14].mxu1  ;;  %v1422_v12 = vpop.f32.mrb[10].mxu0 }
 0x39f   :  { %v1382_v15 = vpop.f32.mrb[15].mxu1  ;;  %v1423_v17 = vpop.f32.mrb[11].mxu0  ;;  %v1113_v11 = vrot.slane %v1040_v58, %v5849_v2  ;;  %v1121_v12 = vrot.slane %v1040_v58, %v5876_v27 }
 0x3a0   :  { %v1117_v15 = vrot.slane %v1040_v58, %v5852_v4  ;;  %v1125_v17 = vrot.slane %v1040_v58, %v1124_v34 }
 0x3a1   :  { %v1378_v18 = vadd.f32 %v6262_v5, %v1113_v11  ;;  %v1419_v19 = vadd.f32 %v6264_v6, %v1121_v12 }
 0x3a2   :  { %v1380_v16 = vadd.f32 %v6266_v7, %v1117_v15  ;;  %v1421_v20 = vadd.f32 %v6268_v8, %v1125_v17  ;;  %v1129_v7 = vrot.slane %v1040_v58, %v1128_v33 }
 0x3bc   :  { %v6306_v25 = vpop.f32.mrb[16].mxu1  ;;  %v6308_v26 = vpop.f32.mrb[12].mxu0 }
 0x3bd   :  { %v4670_v28 = vpop.f32.mrb[17].mxu1  ;;  %v6310_v29 = vpop.f32.mrb[13].mxu0 }
 0x3be   :  { %v1462_v30 = vpop.f32.mrb[18].mxu1  ;;  %v2144_v31 = vpop.f32.mrb[14].mxu0 }
 0x3bf   :  { %v4671_v36 = vpop.f32.mrb[19].mxu1  ;;  %v2145_v32 = vpop.f32.mrb[15].mxu0 }
 0x3dc   :  { %v6320_v39 = vpop.f32.mrb[20].mxu1  ;;  %v2222_v40 = vpop.f32.mrb[16].mxu0 }
 0x3dd   :  { %v6322_v41 = vadd.f32 %v2222_v40, %v1712_v37  ;;  %v2183_v1 = vpop.f32.mrb[21].mxu1  ;;  %v6324_v42 = vpop.f32.mrb[17].mxu0 }
 0x3de   :  { %v6326_v43 = vadd.f32 %v2183_v1, %v1708_v38  ;;  %v2185_v44 = vpop.f32.mrb[22].mxu1  ;;  %v2226_v45 = vpop.f32.mrb[18].mxu0 }
 0x3df   :  { %v2186_v46 = vpop.f32.mrb[23].mxu1  ;;  %v2227_v47 = vpop.f32.mrb[19].mxu0 }
 0x3e0   :  { %v1460_v47 = vadd.f32 %v6306_v25, %v1129_v7  ;;  %v1547_v25 = vld [vmem:[#allocation17] sm:$0xff] }
 0x3fc   :  { %v6328_v48 = vpop.f32.mrb[24].mxu1  ;;  %v6330_v49 = vpop.f32.mrb[20].mxu0 }
 0x3fd   :  { %v6332_v50 = vpop.f32.mrb[25].mxu1  ;;  %v4690_v51 = vpop.f32.mrb[21].mxu0 }
 0x3fe   :  { %v2267_v52 = vpop.f32.mrb[26].mxu1  ;;  %v2307_v53 = vpop.f32.mrb[22].mxu0 }
 0x3ff   :  { %v2268_v54 = vpop.f32.mrb[27].mxu1  ;;  %v4691_v55 = vpop.f32.mrb[23].mxu0 }
 0x41c   :  { %v6338_v59 = vpop.f32.mrb[28].mxu1  ;;  %v2598_v60 = vpop.f32.mrb[24].mxu0 }
 0x41d   :  { %v6340_v61 = vadd.f32 %v2598_v60, %v2391_v57  ;;  %v6342_v62 = vpop.f32.mrb[29].mxu1  ;;  %v4710_v3 = vpop.f32.mrb[25].mxu0 }
 0x41e   :  { %v2561_v9 = vpop.f32.mrb[30].mxu1  ;;  %v2601_v10 = vpop.f32.mrb[26].mxu0 }
 0x41f   :  { %v2562_v13 = vpop.f32.mrb[31].mxu1  ;;  %v4711_v14 = vpop.f32.mrb[27].mxu0 }
 0x420   :  { %v1551_v13 = vld [vmem:[#allocation17 + $0x20] sm:$0xff]  ;;  %v1549_v14 = vld [vmem:[#allocation17 + $0x10] sm:$0xff] }
 0x421   :  { %v4307_v15 = vcombine.low %v1547_v25, %v1551_v13  ;;  %v4308_v17 = vcombine.high %v1547_v25, %v1551_v13  ;;  %v5075_v13 = vld [vmem:[%s6678_s14 + $0xc0] sm:$0xff]  }
 0x423   :  { %3090 = vmatprep.subr.bf16.mxu1 %v4308_v17  ;;  %v5077_v17 = vld [vmem:[%s6678_s14 + $0x80] sm:$0xff]  }
 0x424   :  { %v2662_v21 = vpop.f32.mrb[28].mxu0  ;;  %v2703_v22 = vpop.f32.mrb[32].mxu1 }
 0x425   :  { %v2710_v23 = vmul.f32 %v2662_v21, %v1378_v18  ;;  %v2712_v24 = vmul.f32 %v2703_v22, %v1419_v19  ;;  %v2664_v28 = vpop.f32.mrb[29].mxu0  ;;  %v2705_v30 = vpop.f32.mrb[33].mxu1  ;;  %v1553_v18 = vld [vmem:[#allocation17 + $0x30] sm:$0xff]  ;;  %v1555_v19 = vld [vmem:[#allocation17 + $0x40] sm:$0xff] }
 0x426   :  { %v2711_v31 = vmul.f32 %v2664_v28, %v1380_v16  ;;  %v2713_v36 = vmul.f32 %v2705_v30, %v1421_v20  ;;  %v2666_v32 = vpop.f32.mrb[30].mxu0  ;;  %v2707_v37 = vpop.f32.mrb[34].mxu1  ;;  %v1559_v16 = vld [vmem:[#allocation17 + $0x60] sm:$0xff]  ;;  %v4311_v20 = vcombine.low %v1549_v14, %v1553_v18  ;;  %v4312_v21 = vcombine.high %v1549_v14, %v1553_v18  ;;  %v5080_v14 = vld [vmem:[%s6678_s14 + $0x18] sm:$0xff]   ;;  %v5079_v18 = vld [vmem:[%s6678_s14 + $0xc8] sm:$0xff]  }
 0x427   :  { %v2667_v38 = vpop.f32.mrb[31].mxu0  ;;  %v2708_v34 = vpop.f32.mrb[35].mxu1  ;;  %v2714_v1 = vpack.c.bf16 %v2710_v23, %v2710_v23  ;;  %v2716_v6 = vpack.c.bf16 %v2712_v24, %v2712_v24  ;;  %v4316_v22 = vcombine.high %v1555_v19, %v1559_v16  ;;  %v1557_v23 = vld [vmem:[#allocation17 + $0x50] sm:$0xff]  ;;  %v4315_v30 = vcombine.low %v1555_v19, %v1559_v16  ;;  %v1552_v32 = vld [vmem:[#allocation17 + $0x28] sm:$0xff]  ;;  %v5084_v19 = vld [vmem:[%s6678_s14 + $0x20] sm:$0xff]  }
 0x428   :  { %v2715_v40 = vpack.c.bf16 %v2711_v31, %v2711_v31  ;;  %v2717_v5 = vpack.c.bf16 %v2713_v36, %v2713_v36  ;;  %v1561_v24 = vld [vmem:[#allocation17 + $0x70] sm:$0xff]  ;;  %3172 = vmatprep.subr.bf16.mxu0 %v4312_v21  ;;  %v1548_v36 = vld [vmem:[#allocation17 + $0x8] sm:$0xff]  ;;  %v5070_v34 = vld [vmem:[%s6678_s14 + $0x40] sm:$0xff]  }
 0x429   :  { %v4320_v28 = vcombine.high %v1557_v23, %v1561_v24  ;;  %v4319_v31 = vcombine.low %v1557_v23, %v1561_v24  ;;  %v4310_v37 = vcombine.high %v1548_v36, %v1552_v32  ;;  %v4309_v38 = vcombine.low %v1548_v36, %v1552_v32  ;;  %v5086_v16 = vld [vmem:[%s6678_s14 + $0x68] sm:$0xff]   ;;  %v5083_v21 = vld [vmem:[%s6678_s14 + $0xd0] sm:$0xff]   ;;  %v5091_v36 = vld [vmem:[%s6678_s14 + $0xe0] sm:$0xff]  }
 0x42a   :  { %2942 = vmatprep.mubr.bf16.mxu1 %v2715_v40  ;;  %2982 = vmatprep.mubr.bf16.mxu0 %v2717_v5  ;;  %v5090_v23 = vld [vmem:[%s6678_s14 + $0x70] sm:$0xff]   ;;  %v5093_v32 = vld [vmem:[%s6678_s14 + $0xa0] sm:$0xff]  }
 0x42b   :  { %2943 = vmatmul.mubr.bf16.vlgmr.msra.gmra.mrb[36].mxu1 %v2714_v1  ;;  %2983 = vmatmul.mubr.bf16.vlgmr.msra.gmra.mrb[32].mxu0 %v2716_v6  ;;  %v5085_v24 = vld [vmem:[%s6678_s14 + $0x90] sm:$0xff]  }
 0x42c   :  { %3122 = vmatprep.mubr.bf16.mxu1 %v5449_v0  ;;  %3204 = vmatprep.mubr.bf16.mxu0 %v5449_v0 }
 0x42d   :  { %3091 = vmatpush1.bf16.msra.mxu1 %v4307_v15  ;;  %3173 = vmatpush1.bf16.msra.mxu0 %v4311_v20  ;;  %v5082_v15 = vld [vmem:[%s6678_s14 + $0x60] sm:$0xff]   ;;  %v5081_v20 = vld [vmem:[%s6678_s14 + $0x88] sm:$0xff]  }
 0x42e   :  { %3092 = vmatprep.subr.bf16.mxu1 %v4316_v22  ;;  %3174 = vmatprep.subr.bf16.mxu0 %v4320_v28  ;;  %v5088_v22 = vld [vmem:[%s6678_s14 + $0x28] sm:$0xff]   ;;  %v5087_v28 = vld [vmem:[%s6678_s14 + $0xd8] sm:$0xff]  }
 0x431   :  { %3093 = vmatpush1.bf16.msra.mxu1 %v4315_v30  ;;  %3175 = vmatpush1.bf16.msra.mxu0 %v4319_v31  ;;  %v5092_v30 = vld [vmem:[%s6678_s14 + $0x30] sm:$0xff]   ;;  %v5089_v31 = vld [vmem:[%s6678_s14 + $0x98] sm:$0xff]  }
 0x432   :  { %3131 = vmatprep.subr.bf16.mxu1 %v4310_v37  ;;  %4516 = vmatprep.subr.bf16.mxu0 %v5070_v34  ;;  %v5094_v37 = vld [vmem:[%s6678_s14 + $0x78] sm:$0xff]  }
 0x433   :  { %v5096_v34 = vld [vmem:[%s6678_s14 + $0x38] sm:$0xff]  }
 0x4fe   :  { %v4488_v8 = vpop.f32.mrb[36].mxu1  ;;  %v4510_v44 = vpop.f32.mrb[32].mxu0 }
 0x4ff   :  { %v4489_v45 = vpop.f32.mrb[37].mxu1  ;;  %v4511_v46 = vpop.f32.mrb[33].mxu0 }
 0x500   :  { %v4490_v51 = vadd.f32 %v4489_v45, %v4488_v8  ;;  %v4512_v52 = vadd.f32 %v4511_v46, %v4510_v44  ;;  %v4491_v53 = vpop.f32.mrb[38].mxu1  ;;  %v4513_v54 = vpop.f32.mrb[34].mxu0  ;;  %v1556_v8 = vld [vmem:[#allocation17 + $0x48] sm:$0xff] }
 0x501   :  { %v4492_v55 = vpop.f32.mrb[39].mxu1  ;;  %v4514_v57 = vpop.f32.mrb[35].mxu0  ;;  %v1560_v44 = vld [vmem:[#allocation17 + $0x68] sm:$0xff]  ;;  %v1554_v53 = vld [vmem:[#allocation17 + $0x38] sm:$0xff] }
 0x502   :  { %v2945_v60 = vadd.f32 %v4490_v51, %v1460_v47  ;;  %v4318_v47 = vcombine.high %v1556_v8, %v1560_v44  ;;  %v5071_v51 = vld [vmem:[%s6678_s14] sm:$0xff]   ;;  %v5072_v54 = vld [vmem:[%s6678_s14 + $0x48] sm:$0xff]   ;;  %v4317_v55 = vcombine.low %v1556_v8, %v1560_v44  ;;  %v5104_v8 = vld [vmem:[%s6678_s14 + $0xb8] sm:$0xff]  }
 0x503   :  { %v5107_v44 = vld [vmem:[%s6678_s14 + $0x1c0] sm:$0xff]  }
 0x504   :  { %v2985_v3 = vadd.f32 %v4512_v52, %v2945_v60  ;;  %v1550_v52 = vld [vmem:[#allocation17 + $0x18] sm:$0xff]  ;;  %v5073_v60 = vld [vmem:[%s6678_s14 + $0x8] sm:$0xff]  }
 0x505   :  { %v4314_v57 = vcombine.high %v1550_v52, %v1554_v53 }
 0x506   :  { %v2991_v9 = vsel %vm2990_vm2, %v2985_v3, 0.0 }
 0x507   :  { %2992 = vadd.xlane.f32.xlu0 %v2991_v9  ;;  %v1562_v9 = vld [vmem:[#allocation17 + $0x78] sm:$0xff] }
 0x594   :  { %v2993_v10 = vpop.xlane.xlu0 %2992 }
 0x595   :  { %v2995_v33 = vmul.f32 0.03125, %v2993_v10  ;;  %v5074_v10 = vld [vmem:[%s6678_s14 + $0x50] sm:$0xff]  }
 0x597   :  { %v2996_v58 = vsub.f32 %v2985_v3, %v2995_v33  ;;  %v1558_v3 = vld [vmem:[#allocation17 + $0x58] sm:$0xff]  ;;  %v4313_v33 = vcombine.low %v1550_v52, %v1554_v53 }
 0x598   :  { %v4321_v25 = vcombine.low %v1558_v3, %v1562_v9 }
 0x599   :  { %v2997_v11 = vmul.f32 %v2996_v58, %v2996_v58 }
 0x59b   :  { %v2998_v12 = vsel %vm2990_vm2, %v2997_v11, 0.0  ;;  %v5076_v11 = vld [vmem:[%s6678_s14 + $0x10] sm:$0xff]  }
 0x59c   :  { %2999 = vadd.xlane.f32.xlu0 %v2998_v12  ;;  %v5078_v12 = vld [vmem:[%s6678_s14 + $0x58] sm:$0xff]  }
 0x629   :  { %v3000_v40 = vpop.xlane.xlu0 %2999 }
 0x62a   :  { %v3001_v5 = vmul.f32 0.03125, %v3000_v40  ;;  %v5097_v40 = vld [vmem:[%s6678_s14 + $0xa8] sm:$0xff]  }
 0x62c   :  { %v3002_v1 = vadd.f32 1e-05, %v3001_v5  ;;  %v5098_v5 = vld [vmem:[%s6678_s14 + $0xf0] sm:$0xff]  }
 0x62e   :  { %5168 = vrsqrt.f32 %v3002_v1  ;;  %v5099_v1 = vld [vmem:[%s6678_s14 + $0x140] sm:$0xff]  }
 0x638   :  { %v5169_v6 = vpop.eup %5168 }
 0x639   :  { %v3004_v7 = vmul.f32 %v5169_v6, %v2996_v58  ;;  %v4322_v58 = vcombine.high %v1558_v3, %v1562_v9  ;;  %v5100_v6 = vld [vmem:[%s6678_s14 + $0xb0] sm:$0xff]  }
 0x63b   :  { %5170 = vtanh.f32 %v3004_v7  ;;  %v5102_v7 = vld [vmem:[%s6678_s14 + $0xf8] sm:$0xff]  }
 0x645   :  { %v5171_v45 = vpop.eup %5170 }
 0x646   :  { %v3006_v46 = vpack.c.bf16 %v5171_v45, %v5171_v45  ;;  %v1715_v45 = vsub.s32 5, %v5846_v63 }
 0x648   :  { %4323 = vmatmul.mubr.msk.bf16.vlgmr.msra.gmra.mrb[40].mxu1 %vm2990_vm2, %v3006_v46  ;;  %4325 = vmatmul.mubr.msk.bf16.vlgmr.msra.gmra.mrb[36].mxu0 %vm2990_vm2, %v3006_v46 }
 0x649   :  { %3132 = vmatpush1.bf16.msra.mxu1 %v4309_v38  ;;  %3163 = vmatprep.mubr.bf16.mxu1 %v5449_v0  ;;  %v5095_v38 = vld [vmem:[%s6678_s14 + $0xe8] sm:$0xff]  }
 0x64a   :  { %3133 = vmatprep.subr.bf16.mxu1 %v4318_v47  ;;  %4517 = vmatpush3.bf16.msra.mxu0 %v5071_v51  ;;  %v1700_v47 = vrot.slane %v6314_v35, %v5852_v4  ;;  %v1716_v51 = vrot.slane %v6314_v35, %v1715_v45 }
 0x64b   :  { %4518 = vmatprep.subr.bf16.mxu0 %v5072_v54 }
 0x64c   :  { %v2143_v53 = vadd.f32 %v6310_v29, %v1700_v47  ;;  %v2225_v54 = vadd.f32 %v6324_v42, %v1716_v51  ;;  %v5101_v42 = vld [vmem:[%s6678_s14 + $0x100] sm:$0xff]   ;;  %v5117_v47 = vld [vmem:[%s6678_s14 + $0x190] sm:$0xff]   ;;  %v5118_v51 = vld [vmem:[%s6678_s14 + $0x168] sm:$0xff]  }
 0x64d   :  { %3134 = vmatpush1.bf16.msra.mxu1 %v4317_v55 }
 0x64e   :  { %3213 = vmatprep.subr.bf16.mxu1 %v4314_v57  ;;  %4519 = vmatpush3.bf16.msra.mxu0 %v5073_v60 }
 0x64f   :  { %4520 = vmatprep.subr.bf16.mxu0 %v5074_v10 }
 0x650   :  { %4324 = vmatmul.mubr.msk.bf16.vlgmr.msra.gmra.mrb[44].mxu1 %vm2990_vm2, %v3006_v46 }
 0x651   :  { %3214 = vmatpush1.bf16.msra.mxu1 %v4313_v33  ;;  %3245 = vmatprep.mubr.bf16.mxu1 %v5449_v0 }
 0x652   :  { %3215 = vmatprep.subr.bf16.mxu1 %v4322_v58  ;;  %4521 = vmatpush3.bf16.msra.mxu0 %v5076_v11 }
 0x653   :  { %4522 = vmatprep.subr.bf16.mxu0 %v5078_v12 }
 0x655   :  { %3216 = vmatpush1.bf16.msra.mxu1 %v4321_v25  ;;  %v1704_v25 = vrot.slane %v6314_v35, %v5876_v27  ;;  %v1723_v27 = vsub.s32 7, %v5846_v63 }
 0x656   :  { %4538 = vmatprep.subr.bf16.mxu1 %v5075_v13  ;;  %4523 = vmatpush3.bf16.msra.mxu0 %v5080_v14 }
 0x657   :  { %4524 = vmatprep.subr.bf16.mxu0 %v5082_v15 }
 0x658   :  { %4326 = vmatmul.mubr.msk.bf16.vlgmr.msra.gmra.mrb[48].mxu1 %vm2990_vm2, %v3006_v46  ;;  %v1696_v46 = vrot.slane %v6314_v35, %v5849_v2 }
 0x659   :  { %4539 = vmatpush3.bf16.msra.mxu1 %v5077_v17  ;;  %v2182_v17 = vadd.f32 %v6320_v39, %v1704_v25  ;;  %v5131_v25 = vld [vmem:[%s6678_s14 + $0x1b0] sm:$0xff]  }
 0x65a   :  { %4540 = vmatprep.subr.bf16.mxu1 %v5079_v18  ;;  %4525 = vmatpush3.bf16.msra.mxu0 %v5084_v19  ;;  %v2141_v52 = vadd.f32 %v6308_v26, %v1696_v46  ;;  %v1719_v18 = vsub.s32 6, %v5846_v63  ;;  %v5116_v46 = vld [vmem:[%s6678_s14 + $0x120] sm:$0xff]  }
 0x65b   :  { %4526 = vmatprep.subr.bf16.mxu0 %v5086_v16  ;;  %v5105_v16 = vld [vmem:[%s6678_s14 + $0x108] sm:$0xff]  }
 0x65d   :  { %4541 = vmatpush3.bf16.msra.mxu1 %v5081_v20 }
 0x65e   :  { %4542 = vmatprep.subr.bf16.mxu1 %v5083_v21  ;;  %4527 = vmatpush3.bf16.msra.mxu0 %v5088_v22  ;;  %v5106_v22 = vld [vmem:[%s6678_s14 + $0x150] sm:$0xff]  }
 0x65f   :  { %4528 = vmatprep.subr.bf16.mxu0 %v5090_v23 }
 0x661   :  { %4543 = vmatpush3.bf16.msra.mxu1 %v5085_v24  ;;  %v1720_v24 = vrot.slane %v6314_v35, %v1719_v18 }
 0x662   :  { %4544 = vmatprep.subr.bf16.mxu1 %v5087_v28  ;;  %4529 = vmatpush3.bf16.msra.mxu0 %v5092_v30  ;;  %v1724_v28 = vrot.slane %v6314_v35, %v1723_v27  ;;  %v5111_v35 = vld [vmem:[%s6678_s14 + $0x1c8] sm:$0xff]  }
 0x663   :  { %4530 = vmatprep.subr.bf16.mxu0 %v5094_v37  ;;  %v2264_v37 = vadd.f32 %v6328_v48, %v1720_v24  ;;  %v5114_v48 = vld [vmem:[%s6678_s14 + $0x160] sm:$0xff]  }
 0x665   :  { %4545 = vmatpush3.bf16.msra.mxu1 %v5089_v31  ;;  %v5108_v31 = vld [vmem:[%s6678_s14 + $0x110] sm:$0xff]  }
 0x666   :  { %4546 = vmatprep.subr.bf16.mxu1 %v5091_v36  ;;  %4531 = vmatpush3.bf16.msra.mxu0 %v5096_v34  ;;  %v5109_v36 = vld [vmem:[%s6678_s14 + $0x180] sm:$0xff]  }
 0x667   :  { %4560 = vmatprep.subr.bf16.mxu0 %v5099_v1 }
 0x669   :  { %4547 = vmatpush3.bf16.msra.mxu1 %v5093_v32 }
 0x66a   :  { %4548 = vmatprep.subr.bf16.mxu1 %v5095_v38  ;;  %v2266_v38 = vadd.f32 %v6332_v50, %v1724_v28  ;;  %v5115_v50 = vld [vmem:[%s6678_s14 + $0x1d0] sm:$0xff]  }
 0x66d   :  { %4549 = vmatpush3.bf16.msra.mxu1 %v5097_v40  ;;  %v5112_v40 = vld [vmem:[%s6678_s14 + $0x118] sm:$0xff]  }
 0x66e   :  { %4550 = vmatprep.subr.bf16.mxu1 %v5098_v5  ;;  %v5113_v5 = vld [vmem:[%s6678_s14 + $0x188] sm:$0xff]  }
 0x671   :  { %4551 = vmatpush3.bf16.msra.mxu1 %v5100_v6 }
 0x672   :  { %4552 = vmatprep.subr.bf16.mxu1 %v5102_v7 }
 0x675   :  { %4553 = vmatpush3.bf16.msra.mxu1 %v5104_v8 }
 0x676   :  { %4582 = vmatprep.subr.bf16.mxu1 %v5107_v44 }
 0x71b   :  { %v3124_v55 = vpop.f32.mrb[40].mxu1  ;;  %v3206_v57 = vpop.f32.mrb[36].mxu0 }
 0x71c   :  { %v3254_v60 = vmul.f32 %v3124_v55, %v2141_v52  ;;  %v6476_v3 = vmul.f32 %v3206_v57, %v6322_v41  ;;  %v3126_v9 = vpop.f32.mrb[41].mxu1  ;;  %v3208_v10 = vpop.f32.mrb[37].mxu0  ;;  %v5103_v41 = vld [vmem:[%s6678_s14 + $0x148] sm:$0xff]   ;;  %v5119_v52 = vld [vmem:[%s6678_s14 + $0x1d8] sm:$0xff]   ;;  %v5122_v55 = vld [vmem:[%s6678_s14 + $0x170] sm:$0xff]  }
 0x71d   :  { %v3255_v33 = vmul.f32 %v3126_v9, %v2143_v53  ;;  %v3259_v58 = vmul.f32 %v3208_v10, %v2225_v54  ;;  %v3128_v11 = vpop.f32.mrb[42].mxu1  ;;  %v3210_v12 = vpop.f32.mrb[38].mxu0  ;;  %v5120_v53 = vld [vmem:[%s6678_s14 + $0x128] sm:$0xff]   ;;  %v5121_v54 = vld [vmem:[%s6678_s14 + $0x198] sm:$0xff]   ;;  %v5123_v57 = vld [vmem:[%s6678_s14 + $0x1e0] sm:$0xff]  }
 0x71e   :  { %v3129_v26 = vpop.f32.mrb[43].mxu1  ;;  %v3211_v13 = vpop.f32.mrb[39].mxu0  ;;  %v3262_v14 = vpack.c.bf16 %v3254_v60, %v3254_v60  ;;  %v5124_v60 = vld [vmem:[%s6678_s14 + $0x130] sm:$0xff]   ;;  %v5125_v9 = vld [vmem:[%s6678_s14 + $0x1a0] sm:$0xff]   ;;  %v5126_v10 = vld [vmem:[%s6678_s14 + $0x178] sm:$0xff]  }
 0x71f   :  { %v3263_v29 = vpack.c.bf16 %v3255_v33, %v3255_v33  ;;  %v3267_v15 = vpack.c.bf16 %v3259_v58, %v3259_v58  ;;  %v5127_v33 = vld [vmem:[%s6678_s14 + $0x1e8] sm:$0xff]   ;;  %v5128_v58 = vld [vmem:[%s6678_s14 + $0x138] sm:$0xff]   ;;  %v5130_v12 = vld [vmem:[%s6678_s14 + $0x1f0] sm:$0xff]   ;;  %v3266_v26 = vpack.c.bf16 %v6476_v3, %v6476_v3 }
 0x720   :  { %v5129_v11 = vld [vmem:[%s6678_s14 + $0x1a8] sm:$0xff]   ;;  %v5132_v13 = vld [vmem:[%s6678_s14 + $0x1f8] sm:$0xff]  }
 0x721   :  { %3686 = vmatprep.mubr.bf16.mxu0 %v3263_v29  ;;  %v5133_v29 = vld [vmem:[%s6678_s14 + $0x1b8] sm:$0xff]  }
 0x722   :  { %3687 = vmatmul.mubr.bf16.vlgmr.msra.gmra.mrb[40].mxu0 %v3262_v14  ;;  %v4172_v14 = vld [vmem:[#allocation15 + $0x8] ss:$0 sm:$0xff] }
 0x723   :  { %4561 = vmatpush3.bf16.msra.mxu0 %v5101_v42  ;;  %v3165_v19 = vpop.f32.mrb[44].mxu1  ;;  %3766 = vmatprep.mubr.bf16.mxu0 %v3267_v15  ;;  %v2305_v15 = vadd.f32 %v4172_v14, %v6330_v49  ;;  %v5155_v14 = vld [vmem:[%s6682_s18 + $0x38] sm:$0xff]  }
 0x724   :  { %v3256_v20 = vmul.f32 %v3165_v19, %v2182_v17  ;;  %v3167_v21 = vpop.f32.mrb[45].mxu1  ;;  %4562 = vmatprep.subr.bf16.mxu0 %v5103_v41 }
 0x725   :  { %v3257_v39 = vmul.f32 %v3167_v21, %v6326_v43  ;;  %v3169_v23 = vpop.f32.mrb[46].mxu1  ;;  %v5110_v43 = vld [vmem:[%s6678_s14 + $0x158] sm:$0xff]  }
 0x726   :  { %v3170_v63 = vpop.f32.mrb[47].mxu1  ;;  %v3264_v32 = vpack.c.bf16 %v3256_v20, %v3256_v20 }
 0x727   :  { %v3265_v30 = vpack.c.bf16 %v3257_v39, %v3257_v39  ;;  %4563 = vmatpush3.bf16.msra.mxu0 %v5105_v16 }
 0x728   :  { %4564 = vmatprep.subr.bf16.mxu0 %v5106_v22 }
 0x729   :  { %3726 = vmatprep.mubr.bf16.mxu1 %v3265_v30 }
 0x72a   :  { %3727 = vmatmul.mubr.bf16.vlgmr.msra.gmra.mrb[52].mxu1 %v3264_v32 }
 0x72b   :  { %4565 = vmatpush3.bf16.msra.mxu0 %v5108_v31  ;;  %4583 = vmatpush3.bf16.msra.mxu1 %v5109_v36  ;;  %v3247_v34 = vpop.f32.mrb[48].mxu1 }
 0x72c   :  { %v3260_v1 = vmul.f32 %v3247_v34, %v2264_v37  ;;  %v3249_v6 = vpop.f32.mrb[49].mxu1  ;;  %4566 = vmatprep.subr.bf16.mxu0 %v5110_v43  ;;  %4584 = vmatprep.subr.bf16.mxu1 %v5111_v35 }
 0x72d   :  { %v3261_v7 = vmul.f32 %v3249_v6, %v2266_v38  ;;  %v3251_v8 = vpop.f32.mrb[50].mxu1 }
 0x72e   :  { %v3252_v44 = vpop.f32.mrb[51].mxu1  ;;  %v3268_v42 = vpack.c.bf16 %v3260_v1, %v3260_v1  ;;  %v5137_v8 = vld [vmem:[%s6681_s17 + $0x10] ss:$8 sps:$4 sm:$0xff]  }
 0x72f   :  { %v3269_v45 = vpack.c.bf16 %v3261_v7, %v3261_v7  ;;  %4567 = vmatpush3.bf16.msra.mxu0 %v5112_v40  ;;  %4585 = vmatpush3.bf16.msra.mxu1 %v5113_v5  ;;  %v5139_v7 = vld [vmem:[%s6681_s17 + $0x14] ss:$8 sps:$4 sm:$0xff]   ;;  %v5140_v44 = vld [vmem:[%s6682_s18 + $0x40] sm:$0xff]  }
 0x730   :  { %4568 = vmatprep.subr.bf16.mxu0 %v5114_v48  ;;  %4586 = vmatprep.subr.bf16.mxu1 %v5115_v50  ;;  %v5134_v48 = vld [vmem:[%s6681_s17] ss:$8 sps:$4 sm:$0xff]   ;;  %v5136_v50 = vld [vmem:[%s6681_s17 + $0x4] ss:$8 sps:$4 sm:$0xff]  }
 0x731   :  { %3806 = vmatprep.mubr.bf16.mxu1 %v3269_v45  ;;  %v5141_v45 = vld [vmem:[%s6682_s18] sm:$0xff]  }
 0x733   :  { %4569 = vmatpush3.bf16.msra.mxu0 %v5116_v46  ;;  %4587 = vmatpush3.bf16.msra.mxu1 %v5117_v47  ;;  %v5142_v46 = vld [vmem:[%s6682_s18 + $0x48] sm:$0xff]  }
 0x734   :  { %4570 = vmatprep.subr.bf16.mxu0 %v5118_v51  ;;  %4588 = vmatprep.subr.bf16.mxu1 %v5119_v52  ;;  %v5143_v47 = vld [vmem:[%s6682_s18 + $0x8] sm:$0xff]   ;;  %v5144_v51 = vld [vmem:[%s6682_s18 + $0x50] sm:$0xff]  }
 0x735   :  { %v5145_v52 = vld [vmem:[%s6682_s18 + $0x10] sm:$0xff]  }
 0x737   :  { %4571 = vmatpush3.bf16.msra.mxu0 %v5120_v53  ;;  %4589 = vmatpush3.bf16.msra.mxu1 %v5121_v54  ;;  %v5146_v53 = vld [vmem:[%s6682_s18 + $0x58] sm:$0xff]  }
 0x738   :  { %4572 = vmatprep.subr.bf16.mxu0 %v5122_v55  ;;  %4590 = vmatprep.subr.bf16.mxu1 %v5123_v57  ;;  %v5147_v54 = vld [vmem:[%s6682_s18 + $0x18] sm:$0xff]   ;;  %v5148_v55 = vld [vmem:[%s6682_s18 + $0x60] sm:$0xff]  }
 0x739   :  { %v5149_v57 = vld [vmem:[%s6682_s18 + $0x20] sm:$0xff]  }
 0x73b   :  { %4573 = vmatpush3.bf16.msra.mxu0 %v5124_v60  ;;  %4591 = vmatpush3.bf16.msra.mxu1 %v5125_v9  ;;  %v5150_v60 = vld [vmem:[%s6682_s18 + $0x68] sm:$0xff]  }
 0x73c   :  { %4574 = vmatprep.subr.bf16.mxu0 %v5126_v10  ;;  %4592 = vmatprep.subr.bf16.mxu1 %v5127_v33  ;;  %v5151_v9 = vld [vmem:[%s6682_s18 + $0x28] sm:$0xff]   ;;  %v5152_v10 = vld [vmem:[%s6682_s18 + $0x70] sm:$0xff]  }
 0x73f   :  { %4575 = vmatpush3.bf16.msra.mxu0 %v5128_v58  ;;  %4593 = vmatpush3.bf16.msra.mxu1 %v5129_v11 }
 0x740   :  { %4594 = vmatprep.subr.bf16.mxu1 %v5130_v12  ;;  %3852 = vmatprep.subr.bf16.mxu0 %v5136_v50 }
 0x742   :  { %3767 = vmatmul.mubr.bf16.vlgmr.msra.gmra.mrb[44].mxu0 %v3266_v26 }
 0x743   :  { %4595 = vmatpush3.bf16.msra.mxu1 %v5131_v25  ;;  %3884 = vmatprep.mubr.bf16.mxu0 %v5449_v0 }
 0x744   :  { %4596 = vmatprep.subr.bf16.mxu1 %v5132_v13  ;;  %3853 = vmatpush1.bf16.msra.mxu0 %v5134_v48 }
 0x745   :  { %3854 = vmatprep.subr.bf16.mxu0 %v5139_v7 }
 0x747   :  { %4597 = vmatpush3.bf16.msra.mxu1 %v5133_v29  ;;  %v5153_v29 = vld [vmem:[%s6682_s18 + $0x30] sm:$0xff]  }
 0x748   :  { %3855 = vmatpush1.bf16.msra.mxu0 %v5137_v8  ;;  %4604 = vmatprep.subr.bf16.mxu1 %v5140_v44 }
 0x74a   :  { %3807 = vmatmul.mubr.bf16.vlgmr.msra.gmra.mrb[56].mxu1 %v3268_v42  ;;  %v5154_v42 = vld [vmem:[%s6682_s18 + $0x78] sm:$0xff]   ;;  %s5454_s18 = smov [#allocation20]  }
 0x74b   :  { %4605 = vmatpush3.bf16.msra.mxu1 %v5141_v45  ;;  %s4041_s16 = sshll.u32 %s5454_s18, 4  ;;  %s4042_s16 = int_to_ptr.vmem [resolvable:$true] %s4041_s16 }
 0x74c   :  { %4606 = vmatprep.subr.bf16.mxu1 %v5142_v46  ;;  %s5397_s11 = scalar_lea.vmem %s4042_s16, 128  ;;  %p5402_p11 = scmp.lt.s32.totalorder %s4042_s16, %s4042_s16 }
 0x74d   :  { %p5398_p10 = scmp.ne.s32.totalorder %s4042_s16, %s5397_s11  ;;  %p5403_p12 = scmp.lt.s32.totalorder %s5397_s11, %s5397_s11 }
 0x74f   :  { %4607 = vmatpush3.bf16.msra.mxu1 %v5143_v47  ;;  %p5404_p13 = por %p5403_p12, %p5402_p11 }
 0x750   :  { %4608 = vmatprep.subr.bf16.mxu1 %v5144_v51 }
 0x751   :  { %p5405_p0 = pnand %p5404_p13, %p5398_p10 }
 0x753   :  { %4609 = vmatpush3.bf16.msra.mxu1 %v5145_v52 }
 0x754   :  { %4610 = vmatprep.subr.bf16.mxu1 %v5146_v53 }
 0x757   :  { %4611 = vmatpush3.bf16.msra.mxu1 %v5147_v54 }
 0x758   :  { %4612 = vmatprep.subr.bf16.mxu1 %v5148_v55 }
 0x75b   :  { %4613 = vmatpush3.bf16.msra.mxu1 %v5149_v57 }
 0x75c   :  { %4614 = vmatprep.subr.bf16.mxu1 %v5150_v60 }
 0x75f   :  { %4615 = vmatpush3.bf16.msra.mxu1 %v5151_v9 }
 0x760   :  { %4616 = vmatprep.subr.bf16.mxu1 %v5152_v10 }
 0x763   :  { %4617 = vmatpush3.bf16.msra.mxu1 %v5153_v29 }
 0x764   :  { %4618 = vmatprep.subr.bf16.mxu1 %v5154_v42 }
 0x767   :  { %4619 = vmatpush3.bf16.msra.mxu1 %v5155_v14 }
 0x7f5   :  { %v4532_v41 = vpop.f32.mrb[40].mxu0 }
 0x7f6   :  { %v4533_v3 = vpop.f32.mrb[41].mxu0 }
 0x7f7   :  { %v4534_v17 = vadd.f32 %v4533_v3, %v4532_v41  ;;  %v4535_v18 = vpop.f32.mrb[42].mxu0  ;;  %v2383_v41 = vrot.slane %v6334_v56, %v5849_v2  ;;  %v2387_v3 = vrot.slane %v6334_v56, %v5852_v4 }
 0x7f8   :  { %v4536_v27 = vpop.f32.mrb[43].mxu0 }
 0x7f9   :  { %v3689_v19 = vadd.f32 %v4534_v17, %v2305_v15  ;;  %v2558_v15 = vadd.f32 %v6338_v59, %v2383_v41  ;;  %v2560_v17 = vadd.f32 %v6342_v62, %v2387_v3 }
 0x7fd   :  { %v4554_v16 = vpop.f32.mrb[52].mxu1 }
 0x7fe   :  { %v4555_v20 = vpop.f32.mrb[53].mxu1 }
 0x7ff   :  { %v4556_v21 = vadd.f32 %v4555_v20, %v4554_v16  ;;  %v4557_v22 = vpop.f32.mrb[54].mxu1 }
 0x800   :  { %v4558_v39 = vpop.f32.mrb[55].mxu1 }
 0x801   :  { %v3729_v23 = vadd.f32 %v4556_v21, %v3689_v19 }
 0x815   :  { %v4576_v0 = vpop.f32.mrb[44].mxu0 }
 0x816   :  { %v4577_v24 = vpop.f32.mrb[45].mxu0 }
 0x817   :  { %v4578_v63 = vadd.f32 %v4577_v24, %v4576_v0  ;;  %v4579_v28 = vpop.f32.mrb[46].mxu0 }
 0x818   :  { %v4580_v30 = vpop.f32.mrb[47].mxu0 }
 0x819   :  { %v3769_v31 = vadd.f32 %v4578_v63, %v3729_v23 }
 0x81d   :  { %v4598_v36 = vpop.f32.mrb[56].mxu1 }
 0x81e   :  { %v4599_v32 = vpop.f32.mrb[57].mxu1 }
 0x81f   :  { %v4600_v43 = vadd.f32 %v4599_v32, %v4598_v36  ;;  %v4601_v49 = vpop.f32.mrb[58].mxu1 }
 0x820   :  { %v4602_v35 = vpop.f32.mrb[59].mxu1 }
 0x821   :  { %v3809_v37 = vadd.f32 %v4600_v43, %v3769_v31 }
 0x823   :  { %v3814_v38 = vsel %vm2990_vm2, %v3809_v37, 0.0 }
 0x824   :  { %3815 = vadd.xlane.f32.xlu1 %v3814_v38 }
 0x8b1   :  { %v3816_v34 = vpop.xlane.xlu1 %3815 }
 0x8b2   :  { %v3817_v40 = vmul.f32 0.03125, %v3816_v34 }
 0x8b4   :  { %v3818_v5 = vsub.f32 %v3809_v37, %v3817_v40 }
 0x8b6   :  { %v3819_v1 = vmul.f32 %v3818_v5, %v3818_v5 }
 0x8b8   :  { %v3820_v6 = vsel %vm2990_vm2, %v3819_v1, 0.0 }
 0x8b9   :  { %3821 = vadd.xlane.f32.xlu1 %v3820_v6 }
 0x946   :  { %v3822_v33 = vpop.xlane.xlu1 %3821 }
 0x947   :  { %v3823_v58 = vmul.f32 0.03125, %v3822_v33 }
 0x949   :  { %v3824_v11 = vadd.f32 1e-05, %v3823_v58 }
 0x94b   :  { %5172 = vrsqrt.f32 %v3824_v11 }
 0x955   :  { %v5173_v12 = vpop.eup %5172 }
 0x956   :  { %v3826_v25 = vmul.f32 %v5173_v12, %v3818_v5 }
 0x958   :  { %5174 = vtanh.f32 %v3826_v25 }
 0x962   :  { %v5175_v26 = vpop.eup %5174 }
 0x963   :  { %v3828_v13 = vpack.c.bf16 %v5175_v26, %v5175_v26 }
 0x965   :  { %4395 = vmatmul.mubr.msk.bf16.vlgmr.msra.gmra.mrb[48].mxu0 %vm2990_vm2, %v3828_v13 }
 0xa38   :  { %v3886_v18 = vpop.f32.mrb[48].mxu0 }
 0xa39   :  { %v3893_v27 = vmul.f32 %v3886_v18, %v2558_v15  ;;  %v3888_v19 = vpop.f32.mrb[49].mxu0 }
 0xa3a   :  { %v3894_v16 = vmul.f32 %v3888_v19, %v2560_v17  ;;  %v3890_v20 = vpop.f32.mrb[50].mxu0 }
 0xa3b   :  { %v3891_v21 = vpop.f32.mrb[51].mxu0  ;;  %v3895_v39 = vpack.c.bf16 %v3893_v27, %v3893_v27 }
 0xa3c   :  { %v3896_v22 = vpack.c.bf16 %v3894_v16, %v3894_v16 }
 0xa3e   :  { %4025 = vmatprep.mubr.bf16.mxu1 %v3896_v22 }
 0xa3f   :  { %4026 = vmatmul.mubr.bf16.vlgmr.msra.gmra.mrb[60].mxu1 %v3895_v39 }
 0xb12   :  { %v4620_v23 = vpop.f32.mrb[60].mxu1 }
 0xb13   :  { %v4621_v0 = vpop.f32.mrb[61].mxu1 }
 0xb14   :  { %v4622_v2 = vadd.f32 %v4621_v0, %v4620_v23  ;;  %v4623_v4 = vpop.f32.mrb[62].mxu1 }
 0xb15   :  { %v4624_v56 = vpop.f32.mrb[63].mxu1 }
 0xb16   :  { %v4028_v59 = vadd.f32 %v4622_v2, %v6340_v61 }
 0xb18   :  { %4034 = vst.msk [vmem:[#allocation20] sm:$0xff] %vm4033_vm3, %v4028_v59 }
 0xb19   :  { %5408 = shalt.err (!%p5405_p0)
}
 0xb1a   :  { %s5409_s7 = scalar_lea.hbm %s6683_s19, 128 }
 0xb1b   :  { %p5410_p1 = scmp.ne.s32.totalorder %s6683_s19, %s5409_s7  ;;  %p5413_p2 = scmp.lt.u32.totalorder %s5409_s7, %s6683_s19 }
 0xb1d   :  { %p5415_p3 = pnand %p5413_p2, %p5410_p1 }
 0xb1f   :  { %5418 = shalt.err (!%p5415_p3)
}
 0xb20   :  { %4044 = dma.vmem_to_hbm [thread:$0]  %s4042_s16, 128, %s6683_s19, [#allocation5]  }
 0xb21   :  { %5431 = dma.done.wait [#allocation5], 128  }
 0xb22   :  { %5432 = vsyncadd [#allocation5], 4294967168 }
 0xb23   :  { %4048 = vsyncpa [#allocation4], 1 }
 0xb24   :  { %4049 = vsyncpa [#allocation7], 1 }
 0xb25   :  { %4050 = vsyncpa [#allocation10], 1 }
 0xb26   :  { %4051 = vsyncpa [#allocation13], 1 }
 0xb27   :  { %4052 = vsyncpa [#allocation16], 1 }
 0xb28   :  { %4053 = vsyncpa [#allocation19], 1 }
 0xb29   :  { %4054 = vsyncpa [#allocation5], 1 }

</bundles_post_ra>
